<compile_context>
chip_gen: v7x
topology: tpu7x:2x2x1
jax: 0.10.0
libtpu: 0.0.40
codegen_flags: <defaults>
</compile_context>

<pallas_src>
import functools

import jax
import jax.numpy as jnp
from jax.experimental import pallas as pl
from jax.experimental.pallas import tpu as pltpu


def _decoder_kernel(x_ref, sb_ref, w1x_ref, w2_ref, b2_ref, w3_ref, b3_ref, o_ref):
    # x_ref : (tn, x_dim)           row tile (batch dim squeezed out)
    # sb_ref: (K1, h_dim) f32       per-slot layer-1 bias  (= z @ W1z + b1)
    # w1x   : (x_dim, h_dim)        x-part of layer-1 weight
    # w2/w3 : (h_dim, h_dim), b2/b3: (1, h_dim)
    # o_ref : (tn, K1 * h_dim)      lane-dense output tile
    tn = x_ref.shape[0]
    K1, h_dim = sb_ref.shape

    # Layer-1 x-contribution: once per row tile, shared by all K1 slots.
    xw = jnp.dot(x_ref[...], w1x_ref[...], preferred_element_type=jnp.float32)

    sb = sb_ref[...]                                   # (K1, h) f32
    w2 = w2_ref[...]
    w3 = w3_ref[...]
    # Hoist the invariant bias broadcasts out of the per-slot loop.
    b2 = jnp.broadcast_to(b2_ref[...].astype(jnp.float32), (tn, h_dim))
    b3 = jnp.broadcast_to(b3_ref[...].astype(jnp.float32), (tn, h_dim))

    outs = []
    for k in range(K1):                                # static unroll over slots
        # Add the full layer-1 bias BEFORE the ReLU (correctness requirement).
        h1 = jnp.maximum(xw + sb[k:k + 1, :], 0.0)
        h2 = jnp.dot(h1.astype(w2.dtype), w2, preferred_element_type=jnp.float32)
        h2 = jnp.maximum(h2 + b2, 0.0)
        h3 = jnp.dot(h2.astype(w3.dtype), w3, preferred_element_type=jnp.float32)
        h3 = jnp.maximum(h3 + b3, 0.0)
        outs.append(h3)

    # Single full-width (lane-dense) store of the tile.
    o_ref[...] = jnp.concatenate(outs, axis=-1).astype(o_ref.dtype)


def _row_tile(n, max_tile):
    """Pick a row-tile size <= max_tile; prefer one that divides n evenly."""
    if n <= max_tile:
        return n
    t0 = max(8, (max_tile // 8) * 8)
    for t in range(t0, 7, -8):
        if n % t == 0:
            return t
    # Fall back to a ragged last block (Pallas masks the out-of-range rows).
    return t0


@functools.partial(jax.jit, static_argnames=("n_kps", "max_rows_per_tile"))
def decoder_local_target(x, z, params, n_kps=8, max_rows_per_tile=1024):
    """
    x : (B, N, x_dim)
    z : (bs, 1, n_kps+1, z_dim)   with B % bs == 0
    returns hidden : (B, N, n_kps+1, h_dim)
    """
    w1, b1, w2, b2, w3, b3 = params
    B, N, x_dim = x.shape
    bs, _, K1, z_dim = z.shape          # K1 == n_kps + 1
    h_dim = w1.shape[1]
    assert K1 == n_kps + 1
    assert B % bs == 0

    # --- fold z & the concat into a tiny per-(batch, slot) layer-1 bias -----
    w1x = w1[:x_dim]                    # (x_dim, h_dim)
    w1z = w1[x_dim:]                    # (z_dim, h_dim)
    slot_bias = jnp.einsum(
        "bkz,zh->bkh",
        z[:, 0].astype(jnp.float32),
        w1z.astype(jnp.float32),
        precision=jax.lax.Precision.HIGHEST,
    ) + b1.astype(jnp.float32)[None, :, :]             # (bs, K1, h)
    slot_bias = jnp.tile(slot_bias, (B // bs, 1, 1))    # (B, K1, h)  -- tiny

    # --- hot path: one Pallas kernel, grid over (batch, row tiles) ----------
    tn = _row_tile(N, max_rows_per_tile)
    grid = (B, pl.cdiv(N, tn))

    out = pl.pallas_call(
        _decoder_kernel,
        out_shape=jax.ShapeDtypeStruct((B, N, K1 * h_dim), x.dtype),
        grid_spec=pltpu.PrefetchScalarGridSpec(
            num_scalar_prefetch=0,
            grid=grid,
            in_specs=[
                pl.BlockSpec((None, tn, x_dim), lambda b, i: (b, i, 0)),   # x rows
                pl.BlockSpec((None, K1, h_dim), lambda b, i: (b, 0, 0)),   # slot bias
                pl.BlockSpec((x_dim, h_dim), lambda b, i: (0, 0)),         # W1x
                pl.BlockSpec((h_dim, h_dim), lambda b, i: (0, 0)),         # W2
                pl.BlockSpec((1, h_dim), lambda b, i: (0, 0)),             # b2
                pl.BlockSpec((h_dim, h_dim), lambda b, i: (0, 0)),         # W3
                pl.BlockSpec((1, h_dim), lambda b, i: (0, 0)),             # b3
            ],
            out_specs=pl.BlockSpec((None, tn, K1 * h_dim), lambda b, i: (b, i, 0)),
        ),
        compiler_params=pltpu.CompilerParams(
            dimension_semantics=("parallel", "parallel")),
    )(x, slot_bias, w1x, w2, b2, w3, b3)

    return out.reshape(B, N, K1, h_dim)


def init_params(key, x_dim, z_dim, h_dim):
    """Deterministic PyTorch-Linear-style uniform init."""
    d_in = x_dim + z_dim
    ks = jax.random.split(key, 6)

    def lin(kw, kb, fan_in, fan_out):
        bound = 1.0 / jnp.sqrt(fan_in)
        w = jax.random.uniform(kw, (fan_in, fan_out), jnp.float32, -bound, bound)
        b = jax.random.uniform(kb, (1, fan_out), jnp.float32, -bound, bound)
        return w, b

    w1, b1 = lin(ks[0], ks[1], d_in, h_dim)
    w2, b2 = lin(ks[2], ks[3], h_dim, h_dim)
    w3, b3 = lin(ks[4], ks[5], h_dim, h_dim)
    return (w1, b1, w2, b2, w3, b3)


def _reference(x, z, params, n_kps=8):
    """Pure-JAX reference mirroring the PyTorch forward (split kp / ctr)."""
    w1, b1, w2, b2, w3, b3 = params
    B, N, x_dim = x.shape
    bs, _, K1, z_dim = z.shape
    x_rep = jnp.broadcast_to(x[:, :, None, :], (B, N, K1, x_dim))
    z_rep = jnp.broadcast_to(z, (bs, N, K1, z_dim))
    z_rep = jnp.tile(z_rep, (B // bs, 1, 1, 1))
    inp = jnp.concatenate([x_rep, z_rep], axis=3)

    def mlp(t):
        t = jax.nn.relu(t @ w1 + b1[0])
        t = jax.nn.relu(t @ w2 + b2[0])
        t = jax.nn.relu(t @ w3 + b3[0])
        return t

    hid_kp = mlp(inp[:, :, :n_kps, :])
    hid_ctr = mlp(inp[:, :, -1, :]).reshape(B, N, 1, -1)
    return jnp.concatenate([hid_kp, hid_ctr], axis=2)


if __name__ == "__main__":
    # Small, forward-consistent shapes.
    n_kps = 8
    B, N = 4, 64         # batch_size (bs'), num_points
    bs = 2               # z batch (B % bs == 0)
    x_dim, z_dim, h_dim = 2, 6, 32

    key = jax.random.PRNGKey(0)
    kx, kz, kp = jax.random.split(key, 3)
    x = jax.random.normal(kx, (B, N, x_dim), jnp.float32)
    z = jax.random.normal(kz, (bs, 1, n_kps + 1, z_dim), jnp.float32)
    params = init_params(kp, x_dim, z_dim, h_dim)

    # f32 path (exact check vs pure-JAX reference of the PyTorch forward).
    out = decoder_local_target(x, z, params, n_kps=n_kps)
    out = jax.block_until_ready(out)
    ref = _reference(x, z, params, n_kps=n_kps)
    assert out.shape == (B, N, n_kps + 1, h_dim), out.shape
    assert jnp.allclose(out, ref, atol=1e-4, rtol=1e-4), "mismatch vs reference"

    # bf16 path (v6e/v7x perf option: halves the dominant HBM output stream;
    # accumulation stays f32).  Loose sanity check against the f32 reference.
    x16 = x.astype(jnp.bfloat16)
    p16 = tuple(p.astype(jnp.bfloat16) for p in params)
    out16 = decoder_local_target(x16, z, p16, n_kps=n_kps)
    out16 = jax.block_until_ready(out16)
    assert out16.shape == (B, N, n_kps + 1, h_dim), out16.shape
    err = jnp.max(jnp.abs(out16.astype(jnp.float32) - ref))
    assert float(err) < 0.25, float(err)

    print("KERNEL_OK")
</pallas_src>

<mosaic_0001>
module attributes {stable_mosaic.version = 11 : i64} {
  func.func @_decoder_kernel(%arg0: i32, %arg1: i32, %arg2: memref<1x64x2xf32, #tpu.memory_space<vmem>>, %arg3: memref<1x9x32xf32, #tpu.memory_space<vmem>>, %arg4: memref<2x32xf32, #tpu.memory_space<vmem>>, %arg5: memref<32x32xf32, #tpu.memory_space<vmem>>, %arg6: memref<1x32xf32, #tpu.memory_space<vmem>>, %arg7: memref<32x32xf32, #tpu.memory_space<vmem>>, %arg8: memref<1x32xf32, #tpu.memory_space<vmem>>, %arg9: memref<1x64x288xf32, #tpu.memory_space<vmem>>) attributes {dimension_semantics = [#tpu.dimension_semantics<parallel>, #tpu.dimension_semantics<parallel>], iteration_bounds = array<i64: 4, 1>, scalar_prefetch = 0 : i64, scratch_operands = 0 : i64, tpu.core_type = #tpu.core_type<tc>, window_params = [{transform_indices = @transform_0, window_bounds = array<i64: 1, 64, 2>}, {transform_indices = @transform_1, window_bounds = array<i64: 1, 9, 32>}, {pipeline_mode = #tpu.pipeline_mode<synchronous>, transform_indices = @transform_2, window_bounds = array<i64: 2, 32>}, {pipeline_mode = #tpu.pipeline_mode<synchronous>, transform_indices = @transform_3, window_bounds = array<i64: 32, 32>}, {pipeline_mode = #tpu.pipeline_mode<synchronous>, transform_indices = @transform_4, window_bounds = array<i64: 1, 32>}, {pipeline_mode = #tpu.pipeline_mode<synchronous>, transform_indices = @transform_5, window_bounds = array<i64: 32, 32>}, {pipeline_mode = #tpu.pipeline_mode<synchronous>, transform_indices = @transform_6, window_bounds = array<i64: 1, 32>}, {transform_indices = @transform_7, window_bounds = array<i64: 1, 64, 288>}]} {
    %c0 = arith.constant 0 : index
    %c0_0 = arith.constant 0 : index
    %c0_1 = arith.constant 0 : index
    %0 = vector.load %arg2[%c0, %c0_0, %c0_1] : memref<1x64x2xf32, #tpu.memory_space<vmem>>, vector<1x64x2xf32>
    %1 = vector.shape_cast %0 : vector<1x64x2xf32> to vector<64x2xf32>
    %c0_2 = arith.constant 0 : index
    %c0_3 = arith.constant 0 : index
    %2 = vector.load %arg4[%c0_2, %c0_3] : memref<2x32xf32, #tpu.memory_space<vmem>>, vector<2x32xf32>
    %cst = arith.constant dense<0.000000e+00> : vector<64x32xf32>
    %3 = tpu.matmul %1, %2, %cst {dimension_numbers = #tpu.dot_dimension_numbers<[1], [0], [0], [1], [0, 0, 1, 1], [], []>} : vector<64x2xf32>, vector<2x32xf32>, vector<64x32xf32> -> vector<64x32xf32>
    %c0_4 = arith.constant 0 : index
    %c0_5 = arith.constant 0 : index
    %c0_6 = arith.constant 0 : index
    %4 = vector.load %arg3[%c0_4, %c0_5, %c0_6] : memref<1x9x32xf32, #tpu.memory_space<vmem>>, vector<1x9x32xf32>
    %5 = vector.shape_cast %4 : vector<1x9x32xf32> to vector<9x32xf32>
    %c0_7 = arith.constant 0 : index
    %c0_8 = arith.constant 0 : index
    %6 = vector.load %arg5[%c0_7, %c0_8] : memref<32x32xf32, #tpu.memory_space<vmem>>, vector<32x32xf32>
    %c0_9 = arith.constant 0 : index
    %c0_10 = arith.constant 0 : index
    %7 = vector.load %arg7[%c0_9, %c0_10] : memref<32x32xf32, #tpu.memory_space<vmem>>, vector<32x32xf32>
    %c0_11 = arith.constant 0 : index
    %c0_12 = arith.constant 0 : index
    %8 = vector.load %arg6[%c0_11, %c0_12] : memref<1x32xf32, #tpu.memory_space<vmem>>, vector<1x32xf32>
    %9 = vector.shape_cast %8 : vector<1x32xf32> to vector<1x32xf32>
    %10 = vector.broadcast %9 : vector<1x32xf32> to vector<64x32xf32>
    %c0_13 = arith.constant 0 : index
    %c0_14 = arith.constant 0 : index
    %11 = vector.load %arg8[%c0_13, %c0_14] : memref<1x32xf32, #tpu.memory_space<vmem>>, vector<1x32xf32>
    %12 = vector.shape_cast %11 : vector<1x32xf32> to vector<1x32xf32>
    %13 = vector.broadcast %12 : vector<1x32xf32> to vector<64x32xf32>
    %14 = vector.extract_strided_slice %5 {offsets = [0, 0], sizes = [1, 32], strides = [1, 1]} : vector<9x32xf32> to vector<1x32xf32>
    %15 = vector.broadcast %14 : vector<1x32xf32> to vector<64x32xf32>
    %16 = arith.addf %3, %15 : vector<64x32xf32>
    %cst_15 = arith.constant 0.000000e+00 : f32
    %17 = vector.broadcast %cst_15 : f32 to vector<64x32xf32>
    %18 = arith.maximumf %16, %17 : vector<64x32xf32>
    %cst_16 = arith.constant dense<0.000000e+00> : vector<64x32xf32>
    %19 = tpu.matmul %18, %6, %cst_16 {dimension_numbers = #tpu.dot_dimension_numbers<[1], [0], [0], [1], [0, 0, 1, 1], [], []>} : vector<64x32xf32>, vector<32x32xf32>, vector<64x32xf32> -> vector<64x32xf32>
    %20 = arith.addf %19, %10 : vector<64x32xf32>
    %cst_17 = arith.constant 0.000000e+00 : f32
    %21 = vector.broadcast %cst_17 : f32 to vector<64x32xf32>
    %22 = arith.maximumf %20, %21 : vector<64x32xf32>
    %cst_18 = arith.constant dense<0.000000e+00> : vector<64x32xf32>
    %23 = tpu.matmul %22, %7, %cst_18 {dimension_numbers = #tpu.dot_dimension_numbers<[1], [0], [0], [1], [0, 0, 1, 1], [], []>} : vector<64x32xf32>, vector<32x32xf32>, vector<64x32xf32> -> vector<64x32xf32>
    %24 = arith.addf %23, %13 : vector<64x32xf32>
    %cst_19 = arith.constant 0.000000e+00 : f32
    %25 = vector.broadcast %cst_19 : f32 to vector<64x32xf32>
    %26 = arith.maximumf %24, %25 : vector<64x32xf32>
    %27 = vector.extract_strided_slice %5 {offsets = [1, 0], sizes = [1, 32], strides = [1, 1]} : vector<9x32xf32> to vector<1x32xf32>
    %28 = vector.broadcast %27 : vector<1x32xf32> to vector<64x32xf32>
    %29 = arith.addf %3, %28 : vector<64x32xf32>
    %cst_20 = arith.constant 0.000000e+00 : f32
    %30 = vector.broadcast %cst_20 : f32 to vector<64x32xf32>
    %31 = arith.maximumf %29, %30 : vector<64x32xf32>
    %cst_21 = arith.constant dense<0.000000e+00> : vector<64x32xf32>
    %32 = tpu.matmul %31, %6, %cst_21 {dimension_numbers = #tpu.dot_dimension_numbers<[1], [0], [0], [1], [0, 0, 1, 1], [], []>} : vector<64x32xf32>, vector<32x32xf32>, vector<64x32xf32> -> vector<64x32xf32>
    %33 = arith.addf %32, %10 : vector<64x32xf32>
    %cst_22 = arith.constant 0.000000e+00 : f32
    %34 = vector.broadcast %cst_22 : f32 to vector<64x32xf32>
    %35 = arith.maximumf %33, %34 : vector<64x32xf32>
    %cst_23 = arith.constant dense<0.000000e+00> : vector<64x32xf32>
    %36 = tpu.matmul %35, %7, %cst_23 {dimension_numbers = #tpu.dot_dimension_numbers<[1], [0], [0], [1], [0, 0, 1, 1], [], []>} : vector<64x32xf32>, vector<32x32xf32>, vector<64x32xf32> -> vector<64x32xf32>
    %37 = arith.addf %36, %13 : vector<64x32xf32>
    %cst_24 = arith.constant 0.000000e+00 : f32
    %38 = vector.broadcast %cst_24 : f32 to vector<64x32xf32>
    %39 = arith.maximumf %37, %38 : vector<64x32xf32>
    %40 = vector.extract_strided_slice %5 {offsets = [2, 0], sizes = [1, 32], strides = [1, 1]} : vector<9x32xf32> to vector<1x32xf32>
    %41 = vector.broadcast %40 : vector<1x32xf32> to vector<64x32xf32>
    %42 = arith.addf %3, %41 : vector<64x32xf32>
    %cst_25 = arith.constant 0.000000e+00 : f32
    %43 = vector.broadcast %cst_25 : f32 to vector<64x32xf32>
    %44 = arith.maximumf %42, %43 : vector<64x32xf32>
    %cst_26 = arith.constant dense<0.000000e+00> : vector<64x32xf32>
    %45 = tpu.matmul %44, %6, %cst_26 {dimension_numbers = #tpu.dot_dimension_numbers<[1], [0], [0], [1], [0, 0, 1, 1], [], []>} : vector<64x32xf32>, vector<32x32xf32>, vector<64x32xf32> -> vector<64x32xf32>
    %46 = arith.addf %45, %10 : vector<64x32xf32>
    %cst_27 = arith.constant 0.000000e+00 : f32
    %47 = vector.broadcast %cst_27 : f32 to vector<64x32xf32>
    %48 = arith.maximumf %46, %47 : vector<64x32xf32>
    %cst_28 = arith.constant dense<0.000000e+00> : vector<64x32xf32>
    %49 = tpu.matmul %48, %7, %cst_28 {dimension_numbers = #tpu.dot_dimension_numbers<[1], [0], [0], [1], [0, 0, 1, 1], [], []>} : vector<64x32xf32>, vector<32x32xf32>, vector<64x32xf32> -> vector<64x32xf32>
    %50 = arith.addf %49, %13 : vector<64x32xf32>
    %cst_29 = arith.constant 0.000000e+00 : f32
    %51 = vector.broadcast %cst_29 : f32 to vector<64x32xf32>
    %52 = arith.maximumf %50, %51 : vector<64x32xf32>
    %53 = vector.extract_strided_slice %5 {offsets = [3, 0], sizes = [1, 32], strides = [1, 1]} : vector<9x32xf32> to vector<1x32xf32>
    %54 = vector.broadcast %53 : vector<1x32xf32> to vector<64x32xf32>
    %55 = arith.addf %3, %54 : vector<64x32xf32>
    %cst_30 = arith.constant 0.000000e+00 : f32
    %56 = vector.broadcast %cst_30 : f32 to vector<64x32xf32>
    %57 = arith.maximumf %55, %56 : vector<64x32xf32>
    %cst_31 = arith.constant dense<0.000000e+00> : vector<64x32xf32>
    %58 = tpu.matmul %57, %6, %cst_31 {dimension_numbers = #tpu.dot_dimension_numbers<[1], [0], [0], [1], [0, 0, 1, 1], [], []>} : vector<64x32xf32>, vector<32x32xf32>, vector<64x32xf32> -> vector<64x32xf32>
    %59 = arith.addf %58, %10 : vector<64x32xf32>
    %cst_32 = arith.constant 0.000000e+00 : f32
    %60 = vector.broadcast %cst_32 : f32 to vector<64x32xf32>
    %61 = arith.maximumf %59, %60 : vector<64x32xf32>
    %cst_33 = arith.constant dense<0.000000e+00> : vector<64x32xf32>
    %62 = tpu.matmul %61, %7, %cst_33 {dimension_numbers = #tpu.dot_dimension_numbers<[1], [0], [0], [1], [0, 0, 1, 1], [], []>} : vector<64x32xf32>, vector<32x32xf32>, vector<64x32xf32> -> vector<64x32xf32>
    %63 = arith.addf %62, %13 : vector<64x32xf32>
    %cst_34 = arith.constant 0.000000e+00 : f32
    %64 = vector.broadcast %cst_34 : f32 to vector<64x32xf32>
    %65 = arith.maximumf %63, %64 : vector<64x32xf32>
    %66 = vector.extract_strided_slice %5 {offsets = [4, 0], sizes = [1, 32], strides = [1, 1]} : vector<9x32xf32> to vector<1x32xf32>
    %67 = vector.broadcast %66 : vector<1x32xf32> to vector<64x32xf32>
    %68 = arith.addf %3, %67 : vector<64x32xf32>
    %cst_35 = arith.constant 0.000000e+00 : f32
    %69 = vector.broadcast %cst_35 : f32 to vector<64x32xf32>
    %70 = arith.maximumf %68, %69 : vector<64x32xf32>
    %cst_36 = arith.constant dense<0.000000e+00> : vector<64x32xf32>
    %71 = tpu.matmul %70, %6, %cst_36 {dimension_numbers = #tpu.dot_dimension_numbers<[1], [0], [0], [1], [0, 0, 1, 1], [], []>} : vector<64x32xf32>, vector<32x32xf32>, vector<64x32xf32> -> vector<64x32xf32>
    %72 = arith.addf %71, %10 : vector<64x32xf32>
    %cst_37 = arith.constant 0.000000e+00 : f32
    %73 = vector.broadcast %cst_37 : f32 to vector<64x32xf32>
    %74 = arith.maximumf %72, %73 : vector<64x32xf32>
    %cst_38 = arith.constant dense<0.000000e+00> : vector<64x32xf32>
    %75 = tpu.matmul %74, %7, %cst_38 {dimension_numbers = #tpu.dot_dimension_numbers<[1], [0], [0], [1], [0, 0, 1, 1], [], []>} : vector<64x32xf32>, vector<32x32xf32>, vector<64x32xf32> -> vector<64x32xf32>
    %76 = arith.addf %75, %13 : vector<64x32xf32>
    %cst_39 = arith.constant 0.000000e+00 : f32
    %77 = vector.broadcast %cst_39 : f32 to vector<64x32xf32>
    %78 = arith.maximumf %76, %77 : vector<64x32xf32>
    %79 = vector.extract_strided_slice %5 {offsets = [5, 0], sizes = [1, 32], strides = [1, 1]} : vector<9x32xf32> to vector<1x32xf32>
    %80 = vector.broadcast %79 : vector<1x32xf32> to vector<64x32xf32>
    %81 = arith.addf %3, %80 : vector<64x32xf32>
    %cst_40 = arith.constant 0.000000e+00 : f32
    %82 = vector.broadcast %cst_40 : f32 to vector<64x32xf32>
    %83 = arith.maximumf %81, %82 : vector<64x32xf32>
    %cst_41 = arith.constant dense<0.000000e+00> : vector<64x32xf32>
    %84 = tpu.matmul %83, %6, %cst_41 {dimension_numbers = #tpu.dot_dimension_numbers<[1], [0], [0], [1], [0, 0, 1, 1], [], []>} : vector<64x32xf32>, vector<32x32xf32>, vector<64x32xf32> -> vector<64x32xf32>
    %85 = arith.addf %84, %10 : vector<64x32xf32>
    %cst_42 = arith.constant 0.000000e+00 : f32
    %86 = vector.broadcast %cst_42 : f32 to vector<64x32xf32>
    %87 = arith.maximumf %85, %86 : vector<64x32xf32>
    %cst_43 = arith.constant dense<0.000000e+00> : vector<64x32xf32>
    %88 = tpu.matmul %87, %7, %cst_43 {dimension_numbers = #tpu.dot_dimension_numbers<[1], [0], [0], [1], [0, 0, 1, 1], [], []>} : vector<64x32xf32>, vector<32x32xf32>, vector<64x32xf32> -> vector<64x32xf32>
    %89 = arith.addf %88, %13 : vector<64x32xf32>
    %cst_44 = arith.constant 0.000000e+00 : f32
    %90 = vector.broadcast %cst_44 : f32 to vector<64x32xf32>
    %91 = arith.maximumf %89, %90 : vector<64x32xf32>
    %92 = vector.extract_strided_slice %5 {offsets = [6, 0], sizes = [1, 32], strides = [1, 1]} : vector<9x32xf32> to vector<1x32xf32>
    %93 = vector.broadcast %92 : vector<1x32xf32> to vector<64x32xf32>
    %94 = arith.addf %3, %93 : vector<64x32xf32>
    %cst_45 = arith.constant 0.000000e+00 : f32
    %95 = vector.broadcast %cst_45 : f32 to vector<64x32xf32>
    %96 = arith.maximumf %94, %95 : vector<64x32xf32>
    %cst_46 = arith.constant dense<0.000000e+00> : vector<64x32xf32>
    %97 = tpu.matmul %96, %6, %cst_46 {dimension_numbers = #tpu.dot_dimension_numbers<[1], [0], [0], [1], [0, 0, 1, 1], [], []>} : vector<64x32xf32>, vector<32x32xf32>, vector<64x32xf32> -> vector<64x32xf32>
    %98 = arith.addf %97, %10 : vector<64x32xf32>
    %cst_47 = arith.constant 0.000000e+00 : f32
    %99 = vector.broadcast %cst_47 : f32 to vector<64x32xf32>
    %100 = arith.maximumf %98, %99 : vector<64x32xf32>
    %cst_48 = arith.constant dense<0.000000e+00> : vector<64x32xf32>
    %101 = tpu.matmul %100, %7, %cst_48 {dimension_numbers = #tpu.dot_dimension_numbers<[1], [0], [0], [1], [0, 0, 1, 1], [], []>} : vector<64x32xf32>, vector<32x32xf32>, vector<64x32xf32> -> vector<64x32xf32>
    %102 = arith.addf %101, %13 : vector<64x32xf32>
    %cst_49 = arith.constant 0.000000e+00 : f32
    %103 = vector.broadcast %cst_49 : f32 to vector<64x32xf32>
    %104 = arith.maximumf %102, %103 : vector<64x32xf32>
    %105 = vector.extract_strided_slice %5 {offsets = [7, 0], sizes = [1, 32], strides = [1, 1]} : vector<9x32xf32> to vector<1x32xf32>
    %106 = vector.broadcast %105 : vector<1x32xf32> to vector<64x32xf32>
    %107 = arith.addf %3, %106 : vector<64x32xf32>
    %cst_50 = arith.constant 0.000000e+00 : f32
    %108 = vector.broadcast %cst_50 : f32 to vector<64x32xf32>
    %109 = arith.maximumf %107, %108 : vector<64x32xf32>
    %cst_51 = arith.constant dense<0.000000e+00> : vector<64x32xf32>
    %110 = tpu.matmul %109, %6, %cst_51 {dimension_numbers = #tpu.dot_dimension_numbers<[1], [0], [0], [1], [0, 0, 1, 1], [], []>} : vector<64x32xf32>, vector<32x32xf32>, vector<64x32xf32> -> vector<64x32xf32>
    %111 = arith.addf %110, %10 : vector<64x32xf32>
    %cst_52 = arith.constant 0.000000e+00 : f32
    %112 = vector.broadcast %cst_52 : f32 to vector<64x32xf32>
    %113 = arith.maximumf %111, %112 : vector<64x32xf32>
    %cst_53 = arith.constant dense<0.000000e+00> : vector<64x32xf32>
    %114 = tpu.matmul %113, %7, %cst_53 {dimension_numbers = #tpu.dot_dimension_numbers<[1], [0], [0], [1], [0, 0, 1, 1], [], []>} : vector<64x32xf32>, vector<32x32xf32>, vector<64x32xf32> -> vector<64x32xf32>
    %115 = arith.addf %114, %13 : vector<64x32xf32>
    %cst_54 = arith.constant 0.000000e+00 : f32
    %116 = vector.broadcast %cst_54 : f32 to vector<64x32xf32>
    %117 = arith.maximumf %115, %116 : vector<64x32xf32>
    %118 = vector.extract_strided_slice %5 {offsets = [8, 0], sizes = [1, 32], strides = [1, 1]} : vector<9x32xf32> to vector<1x32xf32>
    %119 = vector.broadcast %118 : vector<1x32xf32> to vector<64x32xf32>
    %120 = arith.addf %3, %119 : vector<64x32xf32>
    %cst_55 = arith.constant 0.000000e+00 : f32
    %121 = vector.broadcast %cst_55 : f32 to vector<64x32xf32>
    %122 = arith.maximumf %120, %121 : vector<64x32xf32>
    %cst_56 = arith.constant dense<0.000000e+00> : vector<64x32xf32>
    %123 = tpu.matmul %122, %6, %cst_56 {dimension_numbers = #tpu.dot_dimension_numbers<[1], [0], [0], [1], [0, 0, 1, 1], [], []>} : vector<64x32xf32>, vector<32x32xf32>, vector<64x32xf32> -> vector<64x32xf32>
    %124 = arith.addf %123, %10 : vector<64x32xf32>
    %cst_57 = arith.constant 0.000000e+00 : f32
    %125 = vector.broadcast %cst_57 : f32 to vector<64x32xf32>
    %126 = arith.maximumf %124, %125 : vector<64x32xf32>
    %cst_58 = arith.constant dense<0.000000e+00> : vector<64x32xf32>
    %127 = tpu.matmul %126, %7, %cst_58 {dimension_numbers = #tpu.dot_dimension_numbers<[1], [0], [0], [1], [0, 0, 1, 1], [], []>} : vector<64x32xf32>, vector<32x32xf32>, vector<64x32xf32> -> vector<64x32xf32>
    %128 = arith.addf %127, %13 : vector<64x32xf32>
    %cst_59 = arith.constant 0.000000e+00 : f32
    %129 = vector.broadcast %cst_59 : f32 to vector<64x32xf32>
    %130 = arith.maximumf %128, %129 : vector<64x32xf32>
    %131 = tpu.concatenate %26, %39, %52, %65, %78, %91, %104, %117, %130 in 1 : vector<64x32xf32>, vector<64x32xf32>, vector<64x32xf32>, vector<64x32xf32>, vector<64x32xf32>, vector<64x32xf32>, vector<64x32xf32>, vector<64x32xf32>, vector<64x32xf32> -> vector<64x288xf32>
    %c0_60 = arith.constant 0 : index
    %c0_61 = arith.constant 0 : index
    %c0_62 = arith.constant 0 : index
    %132 = vector.load %arg9[%c0_60, %c0_61, %c0_62] : memref<1x64x288xf32, #tpu.memory_space<vmem>>, vector<1x64x288xf32>
    %133 = vector.shape_cast %132 : vector<1x64x288xf32> to vector<64x288xf32>
    %134 = vector.shape_cast %131 : vector<64x288xf32> to vector<1x64x288xf32>
    tpu.vector_store %arg9[%c0_60, %c0_61, %c0_62], %134 {strides = array<i32>} : memref<1x64x288xf32, #tpu.memory_space<vmem>>, vector<1x64x288xf32>,
    return
  }
  func.func @transform_0(%arg0: i32, %arg1: i32) -> (i32, i32, i32) {
    %c0_i32 = arith.constant 0 : i32
    %c0_i32_0 = arith.constant 0 : i32
    return %arg0, %arg1, %c0_i32 : i32, i32, i32
  }
  func.func @transform_1(%arg0: i32, %arg1: i32) -> (i32, i32, i32) {
    %c0_i32 = arith.constant 0 : i32
    %c0_i32_0 = arith.constant 0 : i32
    %c0_i32_1 = arith.constant 0 : i32
    return %arg0, %c0_i32, %c0_i32_0 : i32, i32, i32
  }
  func.func @transform_2(%arg0: i32, %arg1: i32) -> (i32, i32) {
    %c0_i32 = arith.constant 0 : i32
    %c0_i32_0 = arith.constant 0 : i32
    %c0_i32_1 = arith.constant 0 : i32
    return %c0_i32, %c0_i32_0 : i32, i32
  }
  func.func @transform_3(%arg0: i32, %arg1: i32) -> (i32, i32) {
    %c0_i32 = arith.constant 0 : i32
    %c0_i32_0 = arith.constant 0 : i32
    %c0_i32_1 = arith.constant 0 : i32
    return %c0_i32, %c0_i32_0 : i32, i32
  }
  func.func @transform_4(%arg0: i32, %arg1: i32) -> (i32, i32) {
    %c0_i32 = arith.constant 0 : i32
    %c0_i32_0 = arith.constant 0 : i32
    %c0_i32_1 = arith.constant 0 : i32
    return %c0_i32, %c0_i32_0 : i32, i32
  }
  func.func @transform_5(%arg0: i32, %arg1: i32) -> (i32, i32) {
    %c0_i32 = arith.constant 0 : i32
    %c0_i32_0 = arith.constant 0 : i32
    %c0_i32_1 = arith.constant 0 : i32
    return %c0_i32, %c0_i32_0 : i32, i32
  }
  func.func @transform_6(%arg0: i32, %arg1: i32) -> (i32, i32) {
    %c0_i32 = arith.constant 0 : i32
    %c0_i32_0 = arith.constant 0 : i32
    %c0_i32_1 = arith.constant 0 : i32
    return %c0_i32, %c0_i32_0 : i32, i32
  }
  func.func @transform_7(%arg0: i32, %arg1: i32) -> (i32, i32, i32) {
    %c0_i32 = arith.constant 0 : i32
    %c0_i32_0 = arith.constant 0 : i32
    return %arg0, %arg1, %c0_i32 : i32, i32, i32
  }
}

</mosaic_0001>

<bundles_post_ra>
// kernel: decoder_local_target.1
= control target key start
LH: loop header
LB: loop body
LE: loop exit
PB: predicated region body
PF: predicated region fallthrough
CT: control target
= control target key end

     0   :  { %s4535_s24 = smov 0   ;;  %s4537_s25 = smov 0   ;;  %s5381_s0 = inlined_call_operand.vmem [shape: f32[4,64,2], index: 0, kind: input, shape index: {}]   ;;  %s5382_s1 = inlined_call_operand.vmem [shape: f32[4,9,32], index: 1, kind: input, shape index: {}]   ;;  %s5383_s2 = inlined_call_operand.vmem [shape: f32[2,32], index: 2, kind: input, shape index: {}]   ;;  %s5384_s3 = inlined_call_operand.vmem [shape: f32[32,32], index: 3, kind: input, shape index: {}]   ;;  %s5385_s4 = inlined_call_operand.vmem [shape: f32[1,32], index: 4, kind: input, shape index: {}]   ;;  %s5386_s5 = inlined_call_operand.vmem [shape: f32[32,32], index: 5, kind: input, shape index: {}]   ;;  %s5387_s6 = inlined_call_operand.vmem [shape: f32[1,32], index: 6, kind: input, shape index: {}]   ;;  %s5388_s7 = inlined_call_operand.vmem [shape: f32[4,64,288], index: 7, kind: output, shape index: {}]  }
   0x1   :  { %s4539_s26 = smov 0  }
   0x2 LB: > { %s29_s27 = sadd.s32 1, %s4486_s25  ;;  %p3529_p0 = scmp.ge.s32.totalorder %s4490_s26, 1  ;;  %s4490_s26 = sphi %s4539_s26, %s17_s26   ;;  %s4486_s25 = sphi %s4537_s25, %s5390_s25   ;;  %s4482_s24 = sphi %s4535_s24, %s5389_s24  }
   0x3   : > { %p31_p1 = scmp.ge.s32.totalorder %s29_s27, 4  ;;  %p268_p2 = scmp.lt.s32.totalorder %s4490_s26, 5 }
   0x5   : > { %s5392_s27 = smov (%p31_p1, %s29_s27), 0  ;;  %p269_p3 = pnand %p3529_p0, %p268_p2 }
   0x6   : > { %v348_v0 = vld [vmem:[%s5383_s2] sm:$0x3] (!%p269_p3)  ;;  %vm374_vm0 = vcmask (!%p269_p3), 1041408   ;;  %p315_p4 = scmp.lt.s32.totalorder (!%p269_p3), %s4482_s24, 3  ;;  %v486_v2 = vld [vmem:[%s5384_s3 + $0x8] sm:$0xff] (!%p269_p3)  ;;  %vm349_vm1 = vcmask (!%p269_p3), 15360   ;;  %v507_v15 = vlaneseq (!%p269_p3) }
   0x7   : > { %272 = sbr.rel (%p269_p3) target bundleno = 913 (0x391), region = 48  ;;  %v485_v1 = vld [vmem:[%s5384_s3] sm:$0xff] (!%p269_p3)  ;;  %3920 = vmatprep.subr.msk.mxu0 (!%p269_p3), %vm374_vm0, %v348_v0  ;;  %4438 = vmatprep.subr.msk.mxu1 (!%p269_p3), %vm374_vm0, %v348_v0  ;;  %v487_v12 = vld [vmem:[%s5384_s3 + $0x10] sm:$0xff] (!%p269_p3)  ;;  %v488_v13 = vld [vmem:[%s5384_s3 + $0x18] sm:$0xff] (!%p269_p3)  ;;  %vm527_vm2 = vcmask (!%p269_p3), 261120   ;;  %s4492_s16 = smov (!%p269_p3), 32  }
   0x8   : > { %3921 = vmatpush3.msk.msra.mxu0 (!%p269_p3), %vm374_vm0, %v348_v0  ;;  %4439 = vmatpush3.msk.msra.mxu1 (!%p269_p3), %vm374_vm0, %v348_v0  ;;  %v4564_v3 = vpack.c.bf16 (!%p269_p3), %v486_v2, %v485_v1  ;;  %v4586_v14 = vpack.c.bf16 (!%p269_p3), %v488_v13, %v487_v12  ;;  %v4597_v16 = vshrl.u32 (!%p269_p3), %v507_v15, 7  ;;  %s4493_s17 = smov (!%p269_p3), 64   ;;  %s4494_s18 = smov (!%p269_p3), 96   ;;  %vm3354_vm3 = vcmask (!%p269_p3), 523264  }
   0x9   : > { %vm3363_vm4 = vcmask (!%p269_p3), 785408  }
   0xa   : > { %4295 = vmatprep.subr.bf16.mxu1 (!%p269_p3), %v4564_v3  ;;  %v1980_v18 = vsub.s32 (!%p269_p3), 5, %v4597_v16  ;;  %v2274_v20 = vsub.s32 (!%p269_p3), 6, %v4597_v16  ;;  %v2568_v22 = vsub.s32 (!%p269_p3), 7, %v4597_v16  ;;  %v509_v24 = vsub.s32 (!%p269_p3), 0, %v4597_v16 }
   0xb   : > { %v804_v41 = vsub.s32 (!%p269_p3), 1, %v4597_v16  ;;  %v1098_v58 = vsub.s32 (!%p269_p3), 2, %v4597_v16 }
   0xe   : > { %s5394_s24 = smov (!%p315_p4, %s4482_s24), 3 }
   0xf   : > { %s3693_s11 = sshll.u32 %s5394_s24, 6  ;;  %s3694_s19 = sshll.u32 %s5394_s24, 4 }
  0x10   : > { %s322_s14 = scalar_lea.vmem %s5381_s0, %s3693_s11  ;;  %s4595_s22 = scalar_lea.vmem %s5382_s1, %s3694_s19 }
  0x11   : > { %v340_v4 = vld [vmem:[%s322_s14] sm:$0xff]  ;;  %v341_v5 = vld [vmem:[%s322_s14 + $0x8] sm:$0xff]  ;;  %v342_v6 = vld [vmem:[%s322_s14 + $0x10] sm:$0xff]  ;;  %s4440_s19 = smul.u32 192, %s5394_s24 }
  0x12   : > { %3922 = vmatprep.mubr.msk.f32.mxu0 %vm349_vm1, %v340_v4  ;;  %v344_v7 = vld [vmem:[%s322_s14 + $0x20] sm:$0xff]  ;;  %v345_v8 = vld [vmem:[%s322_s14 + $0x28] sm:$0xff]  ;;  %v346_v9 = vld [vmem:[%s322_s14 + $0x30] sm:$0xff] }
  0x13   : > { %3923 = vmatmul.mubr.msk.f32.vlgmr.msra.gmra.mrb[0].mxu0 %vm349_vm1, %v341_v5  ;;  %3928 = vmatprep.mubr.msk.f32.mxu1 %vm349_vm1, %v344_v7  ;;  %v343_v10 = vld [vmem:[%s322_s14 + $0x18] sm:$0xff]  ;;  %v4600_v17 = vld [vmem:[%s4595_s22] sm:$0xff] }
  0x14   : > { %3925 = vmatprep.mubr.msk.f32.mxu0 %vm349_vm1, %v342_v6  ;;  %3929 = vmatmul.mubr.msk.f32.vlgmr.msra.gmra.mrb[0].mxu1 %vm349_vm1, %v345_v8  ;;  %v347_v11 = vld [vmem:[%s322_s14 + $0x38] sm:$0xff]  ;;  %v4604_v19 = vrot.slane %v4600_v17, %v1980_v18  ;;  %v4608_v21 = vrot.slane %v4600_v17, %v2274_v20  ;;  %v4612_v23 = vrot.slane %v4600_v17, %v2568_v22 }
  0x15   : > { %3931 = vmatprep.mubr.msk.f32.mxu1 %vm349_vm1, %v346_v9  ;;  %4297 = vmatpush3.bf16.msra.mxu1 %v4564_v3  ;;  %v510_v25 = vrot.slane %v4600_v17, %v509_v24  ;;  %v805_v47 = vrot.slane %v4600_v17, %v804_v41  ;;  %v1099_v8 = vrot.slane %v4600_v17, %v1098_v58 }
  0x16   : > { %4299 = vmatprep.subr.bf16.mxu1 %v4586_v14 }
  0x17   : > { %3926 = vmatmul.mubr.msk.f32.gmra.mrb[2].mxu0 %vm349_vm1, %v343_v10 }
  0x18   : > { %3932 = vmatmul.mubr.msk.f32.gmra.mrb[2].mxu1 %vm349_vm1, %v347_v11 }
  0x19   : > { %4301 = vmatpush3.bf16.msra.mxu1 %v4586_v14 }
  0x1a   : > { %4311 = vmatprep.subr.bf16.mxu1 %v4564_v3 }
  0xe6   : > { %v4616_v26 = vpop.f32.mrb[0].mxu0 }
  0xe7   : > { %v4618_v27 = vpop.f32.mrb[1].mxu0  ;;  %v4620_v28 = vpop.f32.mrb[0].mxu1  ;;  %v512_v29 = vadd.f32 %v4616_v26, %v510_v25  ;;  %v807_v53 = vadd.f32 %v4616_v26, %v805_v47  ;;  %v4663_v57 = vadd.f32 %v4616_v26, %v4604_v19  ;;  %v4700_v7 = vadd.f32 %v4616_v26, %v4608_v21 }
  0xe8   : > { %v511_v30 = vadd.f32 %v510_v25, %v4618_v27  ;;  %v4624_v31 = vpop.f32.mrb[1].mxu1  ;;  %v516_v46 = vadd.f32 %v4620_v28, %v510_v25  ;;  %v806_v51 = vadd.f32 %v805_v47, %v4618_v27  ;;  %v4659_v56 = vadd.f32 %v4604_v19, %v4618_v27 }
  0xe9   : > { %v515_v34 = vadd.f32 %v510_v25, %v4624_v31  ;;  %v520_v36 = vmax.f32 %v512_v29, 0.0  ;;  %v815_v59 = vmax.f32 %v807_v53, 0.0  ;;  %v810_v62 = vadd.f32 %v805_v47, %v4624_v31 }
  0xea   : > { %v4626_v32 = vpop.f32.mrb[2].mxu0  ;;  %v519_v33 = vmax.f32 %v511_v30, 0.0  ;;  %v524_v49 = vmax.f32 %v516_v46, 0.0  ;;  %v814_v55 = vmax.f32 %v806_v51, 0.0  ;;  %v4679_v1 = vadd.f32 %v4604_v19, %v4624_v31 }
  0xeb   : > { %v4629_v35 = vpop.f32.mrb[3].mxu0  ;;  %v4631_v37 = vpop.f32.mrb[2].mxu1  ;;  %v514_v38 = vadd.f32 %v4626_v32, %v510_v25  ;;  %v523_v43 = vmax.f32 %v515_v34, 0.0  ;;  %v809_v61 = vadd.f32 %v4626_v32, %v805_v47  ;;  %v4675_v0 = vadd.f32 %v4626_v32, %v4604_v19 }
  0xec   : > { %3942 = vmatprep.mubr.msk.f32.mxu1 %vm527_vm2, %v519_v33  ;;  %v513_v39 = vadd.f32 %v510_v25, %v4629_v35  ;;  %v4636_v40 = vpop.f32.mrb[3].mxu1  ;;  %v518_v50 = vadd.f32 %v4631_v37, %v510_v25  ;;  %v808_v54 = vadd.f32 %v805_v47, %v4629_v35  ;;  %v4671_v63 = vadd.f32 %v4604_v19, %v4629_v35 }
  0xed   : > { %3943 = vmatmul.mubr.msk.f32.vlgmr.msra.gmra.mrb[4].mxu1 %vm527_vm2, %v520_v36  ;;  %v517_v44 = vadd.f32 %v510_v25, %v4636_v40  ;;  %v522_v45 = vmax.f32 %v514_v38, 0.0  ;;  %v4683_v2 = vadd.f32 %v4620_v28, %v4604_v19  ;;  %v4688_v4 = vadd.f32 %v4604_v19, %v4636_v40 }
  0xee   : > { %4313 = vmatpush3.bf16.msra.mxu1 %v4564_v3  ;;  %v521_v42 = vmax.f32 %v513_v39, 0.0  ;;  %v526_v52 = vmax.f32 %v518_v50, 0.0  ;;  %v816_v60 = vmax.f32 %v808_v54, 0.0  ;;  %v4692_v5 = vadd.f32 %v4631_v37, %v4604_v19 }
  0xef   : > { %4315 = vmatprep.subr.bf16.mxu1 %v4586_v14  ;;  %v525_v48 = vmax.f32 %v517_v44, 0.0  ;;  %v4696_v6 = vadd.f32 %v4608_v21, %v4618_v27  ;;  %v817_v9 = vmax.f32 %v809_v61, 0.0  ;;  %v818_v10 = vmax.f32 %v810_v62, 0.0  ;;  %v490_v44 = vld [vmem:[%s5386_s5 + $0x8] sm:$0xff] }
  0xf0   : > { %3945 = vmatprep.mubr.msk.f32.mxu1 %vm527_vm2, %v521_v42  ;;  %v811_v11 = vadd.f32 %v4620_v28, %v805_v47  ;;  %v812_v12 = vadd.f32 %v805_v47, %v4636_v40  ;;  %v4710_v13 = vadd.f32 %v4608_v21, %v4629_v35  ;;  %v4714_v15 = vadd.f32 %v4626_v32, %v4608_v21 }
  0xf1   : > { %3946 = vmatmul.mubr.msk.f32.gmra.mrb[6].mxu1 %vm527_vm2, %v522_v45  ;;  %v4718_v18 = vadd.f32 %v4608_v21, %v4624_v31  ;;  %v4722_v19 = vadd.f32 %v4620_v28, %v4608_v21  ;;  %v4727_v20 = vadd.f32 %v4608_v21, %v4636_v40  ;;  %v4731_v22 = vadd.f32 %v4631_v37, %v4608_v21 }
  0xf2   : > { %3948 = vmatprep.mubr.msk.f32.mxu1 %vm527_vm2, %v523_v43  ;;  %4317 = vmatpush3.bf16.msra.mxu1 %v4586_v14  ;;  %v4735_v24 = vadd.f32 %v4612_v23, %v4618_v27  ;;  %v4739_v25 = vadd.f32 %v4616_v26, %v4612_v23  ;;  %v819_v29 = vmax.f32 %v811_v11, 0.0  ;;  %v820_v30 = vmax.f32 %v812_v12, 0.0  ;;  %v489_v43 = vld [vmem:[%s5386_s5] sm:$0xff] }
  0xf3   : > { %4327 = vmatprep.subr.bf16.mxu1 %v4564_v3  ;;  %v813_v33 = vadd.f32 %v4631_v37, %v805_v47  ;;  %v1100_v34 = vadd.f32 %v1099_v8, %v4618_v27  ;;  %v4748_v21 = vadd.f32 %v4612_v23, %v4629_v35  ;;  %v4752_v36 = vadd.f32 %v4626_v32, %v4612_v23 }
  0xf4   : > { %v4756_v38 = vadd.f32 %v4612_v23, %v4624_v31  ;;  %v4760_v39 = vadd.f32 %v4620_v28, %v4612_v23  ;;  %v4765_v41 = vadd.f32 %v4612_v23, %v4636_v40  ;;  %v4769_v42 = vadd.f32 %v4631_v37, %v4612_v23 }
  0xf5   : > { %3949 = vmatmul.mubr.msk.f32.gmra.mrb[8].mxu1 %vm527_vm2, %v524_v49  ;;  %v821_v45 = vmax.f32 %v813_v33, 0.0  ;;  %v1101_v46 = vadd.f32 %v4616_v26, %v1099_v8  ;;  %v1108_v47 = vmax.f32 %v1100_v34, 0.0  ;;  %v4781_v23 = vpack.c.bf16 %v490_v44, %v489_v43 }
  0xf6   : > { %3951 = vmatprep.mubr.msk.f32.mxu1 %vm527_vm2, %v525_v48  ;;  %v1102_v48 = vadd.f32 %v1099_v8, %v4629_v35  ;;  %v1103_v50 = vadd.f32 %v4626_v32, %v1099_v8  ;;  %v1392_v53 = vsub.s32 3, %v4597_v16  ;;  %v1107_v62 = vadd.f32 %v4631_v37, %v1099_v8 }
  0xf7   : > { %v1109_v49 = vmax.f32 %v1101_v46, 0.0  ;;  %4303 = vmatprep.subr.bf16.mxu0 %v4781_v23  ;;  %v1686_v44 = vsub.s32 4, %v4597_v16 }
  0xf8   : > { %v1110_v51 = vmax.f32 %v1102_v48, 0.0  ;;  %4305 = vmatpush3.bf16.msra.mxu0 %v4781_v23  ;;  %v1111_v54 = vmax.f32 %v1103_v50, 0.0  ;;  %v1115_v11 = vmax.f32 %v1107_v62, 0.0 }
  0xf9   : > { %3952 = vmatmul.mubr.msk.f32.gmra.mrb[10].mxu1 %vm527_vm2, %v526_v52  ;;  %v1104_v52 = vadd.f32 %v1099_v8, %v4624_v31 }
  0xfa   : > { %3982 = vmatprep.mubr.msk.f32.mxu1 %vm527_vm2, %v814_v55  ;;  %v1105_v55 = vadd.f32 %v4620_v28, %v1099_v8 }
  0xfb   : > { %v1112_v58 = vmax.f32 %v1104_v52, 0.0 }
  0xfc   : > { %v1113_v61 = vmax.f32 %v1105_v55, 0.0 }
  0xfd   : > { %3983 = vmatmul.mubr.msk.f32.vlgmr.msra.gmra.mrb[12].mxu1 %vm527_vm2, %v815_v59  ;;  %v1106_v59 = vadd.f32 %v1099_v8, %v4636_v40 }
  0xfe   : > { %4329 = vmatpush3.bf16.msra.mxu1 %v4564_v3  ;;  %3985 = vmatprep.mubr.msk.f32.mxu1 %vm527_vm2, %v816_v60  ;;  %v1393_v60 = vrot.slane %v4600_v17, %v1392_v53 }
  0xff   : > { %4331 = vmatprep.subr.bf16.mxu1 %v4586_v14 }
 0x100   : > { %v1395_v12 = vadd.f32 %v4616_v26, %v1393_v60  ;;  %v1397_v33 = vadd.f32 %v4626_v32, %v1393_v60  ;;  %v1398_v43 = vadd.f32 %v1393_v60, %v4624_v31  ;;  %v1399_v46 = vadd.f32 %v4620_v28, %v1393_v60 }
 0x101   : > { %3986 = vmatmul.mubr.msk.f32.gmra.mrb[14].mxu1 %vm527_vm2, %v817_v9  ;;  %v1114_v9 = vmax.f32 %v1106_v59, 0.0  ;;  %v1400_v48 = vadd.f32 %v1393_v60, %v4636_v40  ;;  %v1401_v50 = vadd.f32 %v4631_v37, %v1393_v60 }
 0x102   : > { %3988 = vmatprep.mubr.msk.f32.mxu1 %vm527_vm2, %v818_v10  ;;  %4333 = vmatpush3.bf16.msra.mxu1 %v4586_v14  ;;  %v1394_v10 = vadd.f32 %v1393_v60, %v4618_v27  ;;  %v1403_v8 = vmax.f32 %v1395_v12, 0.0  ;;  %v1407_v16 = vmax.f32 %v1399_v46, 0.0  ;;  %v2285_v46 = vmax.f32 %v4700_v7, 0.0 }
 0x103   : > { %4343 = vmatprep.subr.bf16.mxu1 %v4564_v3  ;;  %v1409_v53 = vmax.f32 %v1401_v50, 0.0  ;;  %v2289_v7 = vmax.f32 %v4722_v19, 0.0  ;;  %v2580_v19 = vmax.f32 %v4748_v21, 0.0  ;;  %v2584_v21 = vmax.f32 %v4765_v41, 0.0 }
 0x105   : > { %3989 = vmatmul.mubr.msk.f32.gmra.mrb[16].mxu1 %vm527_vm2, %v819_v29  ;;  %v1402_v29 = vmax.f32 %v1394_v10, 0.0 }
 0x106   : > { %3991 = vmatprep.mubr.msk.f32.mxu1 %vm527_vm2, %v820_v30  ;;  %v1396_v30 = vadd.f32 %v1393_v60, %v4629_v35 }
 0x108   : > { %v1404_v34 = vmax.f32 %v1396_v30, 0.0 }
 0x109   : > { %3992 = vmatmul.mubr.msk.f32.gmra.mrb[18].mxu1 %vm527_vm2, %v821_v45  ;;  %v1405_v45 = vmax.f32 %v1397_v33, 0.0  ;;  %v1990_v33 = vmax.f32 %v4659_v56, 0.0  ;;  %v1994_v56 = vmax.f32 %v4679_v1, 0.0  ;;  %v492_v1 = vld [vmem:[%s5386_s5 + $0x18] sm:$0xff] }
 0x10a   : > { %4022 = vmatprep.mubr.msk.f32.mxu1 %vm527_vm2, %v1108_v47  ;;  %v1406_v47 = vmax.f32 %v1398_v43, 0.0  ;;  %v1992_v43 = vmax.f32 %v4671_v63, 0.0  ;;  %v1996_v63 = vmax.f32 %v4688_v4, 0.0  ;;  %v2284_v4 = vmax.f32 %v4696_v6, 0.0 }
 0x10b   : > { %v2288_v6 = vmax.f32 %v4718_v18, 0.0  ;;  %v2578_v18 = vmax.f32 %v4735_v24, 0.0  ;;  %v3674_v24 = vld [vmem:[%s4595_s22 + $0x8] ss:$0 sm:$0xff]  ;;  %s5250_s22 = scalar_lea.vmem %s5388_s7, %s4440_s19 }
 0x10d   : > { %4023 = vmatmul.mubr.msk.f32.vlgmr.msra.gmra.mrb[20].mxu1 %vm527_vm2, %v1109_v49  ;;  %v1687_v49 = vrot.slane %v4600_v17, %v1686_v44  ;;  %v1993_v44 = vmax.f32 %v4675_v0, 0.0  ;;  %v491_v0 = vld [vmem:[%s5386_s5 + $0x10] sm:$0xff] }
 0x10e   : > { %4345 = vmatpush3.bf16.msra.mxu1 %v4564_v3  ;;  %4025 = vmatprep.mubr.msk.f32.mxu1 %vm527_vm2, %v1110_v51  ;;  %v1408_v51 = vmax.f32 %v1400_v48, 0.0  ;;  %v2579_v48 = vmax.f32 %v4739_v25, 0.0  ;;  %v2583_v25 = vmax.f32 %v4760_v39, 0.0  ;;  %v2867_v39 = vadd.f32 %v4626_v32, %v3674_v24 }
 0x10f   : > { %4347 = vmatprep.subr.bf16.mxu1 %v4586_v14  ;;  %v1688_v52 = vadd.f32 %v1687_v49, %v4618_v27  ;;  %v1689_v17 = vadd.f32 %v4616_v26, %v1687_v49  ;;  %v1690_v55 = vadd.f32 %v1687_v49, %v4629_v35  ;;  %v1691_v59 = vadd.f32 %v4626_v32, %v1687_v49 }
 0x110   : > { %v2871_v32 = vadd.f32 %v4631_v37, %v3674_v24 }
 0x111   : > { %4026 = vmatmul.mubr.msk.f32.gmra.mrb[22].mxu1 %vm527_vm2, %v1111_v54  ;;  %v1696_v54 = vmax.f32 %v1688_v52, 0.0  ;;  %v1698_v60 = vmax.f32 %v1690_v55, 0.0  ;;  %v1699_v62 = vmax.f32 %v1691_v59, 0.0 }
 0x112   : > { %4028 = vmatprep.mubr.msk.f32.mxu1 %vm527_vm2, %v1112_v58  ;;  %4349 = vmatpush3.bf16.msra.mxu1 %v4586_v14  ;;  %v1697_v58 = vmax.f32 %v1689_v17, 0.0 }
 0x113   : > { %4359 = vmatprep.subr.bf16.mxu1 %v4564_v3 }
 0x115   : > { %4029 = vmatmul.mubr.msk.f32.gmra.mrb[24].mxu1 %vm527_vm2, %v1113_v61  ;;  %v1692_v61 = vadd.f32 %v1687_v49, %v4624_v31 }
 0x116   : > { %4031 = vmatprep.mubr.msk.f32.mxu1 %vm527_vm2, %v1114_v9  ;;  %v1693_v9 = vadd.f32 %v4620_v28, %v1687_v49 }
 0x117   : > { %v1700_v10 = vmax.f32 %v1692_v61, 0.0 }
 0x118   : > { %v1701_v12 = vmax.f32 %v1693_v9, 0.0 }
 0x119   : > { %4032 = vmatmul.mubr.msk.f32.gmra.mrb[26].mxu1 %vm527_vm2, %v1115_v11  ;;  %v1694_v11 = vadd.f32 %v1687_v49, %v4636_v40 }
 0x11a   : > { %4062 = vmatprep.mubr.msk.f32.mxu1 %vm527_vm2, %v1402_v29  ;;  %v1695_v29 = vadd.f32 %v4631_v37, %v1687_v49  ;;  %v2864_v49 = vadd.f32 %v3674_v24, %v4618_v27  ;;  %v2868_v27 = vadd.f32 %v3674_v24, %v4624_v31  ;;  %v2879_v31 = vmax.f32 %v2871_v32, 0.0 }
 0x11b   : > { %v1702_v30 = vmax.f32 %v1694_v11, 0.0 }
 0x11c   : > { %v2876_v50 = vmax.f32 %v2868_v27, 0.0 }
 0x11d   : > { %4063 = vmatmul.mubr.msk.f32.vlgmr.msra.gmra.mrb[28].mxu1 %vm527_vm2, %v1403_v8  ;;  %v1703_v8 = vmax.f32 %v1695_v29, 0.0 }
 0x11e   : > { %4361 = vmatpush3.bf16.msra.mxu1 %v4564_v3  ;;  %4065 = vmatprep.mubr.msk.f32.mxu1 %vm527_vm2, %v1404_v34  ;;  %v1991_v34 = vmax.f32 %v4663_v57, 0.0  ;;  %v1995_v57 = vmax.f32 %v4683_v2, 0.0  ;;  %v1997_v2 = vmax.f32 %v4692_v5, 0.0  ;;  %v2287_v5 = vmax.f32 %v4714_v15, 0.0 }
 0x11f   : > { %4363 = vmatprep.subr.bf16.mxu1 %v4586_v14  ;;  %v2291_v15 = vmax.f32 %v4731_v22, 0.0  ;;  %v2582_v22 = vmax.f32 %v4756_v38, 0.0  ;;  %v2872_v38 = vmax.f32 %v2864_v49, 0.0 }
 0x121   : > { %4066 = vmatmul.mubr.msk.f32.gmra.mrb[30].mxu1 %vm527_vm2, %v1405_v45  ;;  %v4869_v45 = vpack.c.bf16 %v492_v1, %v491_v0 }
 0x122   : > { %4068 = vmatprep.mubr.msk.f32.mxu1 %vm527_vm2, %v1406_v47  ;;  %4365 = vmatpush3.bf16.msra.mxu1 %v4586_v14  ;;  %v2286_v47 = vmax.f32 %v4710_v13, 0.0  ;;  %v2290_v13 = vmax.f32 %v4727_v20, 0.0  ;;  %v2581_v20 = vmax.f32 %v4752_v36, 0.0  ;;  %v2865_v36 = vadd.f32 %v4616_v26, %v3674_v24 }
 0x123   : > { %4375 = vmatprep.subr.bf16.mxu1 %v4564_v3  ;;  %4307 = vmatprep.subr.bf16.mxu0 %v4869_v45  ;;  %v2869_v26 = vadd.f32 %v4620_v28, %v3674_v24  ;;  %v4936_v28 = vld [vmem:[%s5385_s4] ss:$0 sm:$0xff] }
 0x124   : > { %4309 = vmatpush3.bf16.msra.mxu0 %v4869_v45 }
 0x125   : > { %4069 = vmatmul.mubr.msk.f32.gmra.mrb[32].mxu1 %vm527_vm2, %v1407_v16  ;;  %4319 = vmatprep.subr.bf16.mxu0 %v4781_v23  ;;  %v2866_v16 = vadd.f32 %v3674_v24, %v4629_v35  ;;  %v2870_v35 = vadd.f32 %v3674_v24, %v4636_v40 }
 0x126   : > { %4071 = vmatprep.mubr.msk.f32.mxu1 %vm527_vm2, %v1408_v51  ;;  %v2877_v51 = vmax.f32 %v2869_v26, 0.0 }
 0x127   : > { %v2874_v41 = vmax.f32 %v2866_v16, 0.0  ;;  %v2878_v52 = vmax.f32 %v2870_v35, 0.0 }
 0x129   : > { %4072 = vmatmul.mubr.msk.f32.gmra.mrb[34].mxu1 %vm527_vm2, %v1409_v53 }
 0x12a   : > { %4102 = vmatprep.mubr.msk.f32.mxu1 %vm527_vm2, %v1696_v54 }
 0x12d   : > { %4103 = vmatmul.mubr.msk.f32.vlgmr.msra.gmra.mrb[36].mxu1 %vm527_vm2, %v1697_v58 }
 0x12e   : > { %4377 = vmatpush3.bf16.msra.mxu1 %v4564_v3  ;;  %4105 = vmatprep.mubr.msk.f32.mxu1 %vm527_vm2, %v1698_v60 }
 0x12f   : > { %4379 = vmatprep.subr.bf16.mxu1 %v4586_v14 }
 0x131   : > { %4106 = vmatmul.mubr.msk.f32.gmra.mrb[38].mxu1 %vm527_vm2, %v1699_v62 }
 0x132   : > { %4108 = vmatprep.mubr.msk.f32.mxu1 %vm527_vm2, %v1700_v10  ;;  %4381 = vmatpush3.bf16.msra.mxu1 %v4586_v14 }
 0x133   : > { %4391 = vmatprep.subr.bf16.mxu1 %v4564_v3 }
 0x135   : > { %4109 = vmatmul.mubr.msk.f32.gmra.mrb[40].mxu1 %vm527_vm2, %v1701_v12 }
 0x136   : > { %4111 = vmatprep.mubr.msk.f32.mxu1 %vm527_vm2, %v1702_v30 }
 0x139   : > { %4112 = vmatmul.mubr.msk.f32.gmra.mrb[42].mxu1 %vm527_vm2, %v1703_v8 }
 0x13a   : > { %4142 = vmatprep.mubr.msk.f32.mxu1 %vm527_vm2, %v1990_v33 }
 0x13d   : > { %4143 = vmatmul.mubr.msk.f32.vlgmr.msra.gmra.mrb[44].mxu1 %vm527_vm2, %v1991_v34 }
 0x13e   : > { %4393 = vmatpush3.bf16.msra.mxu1 %v4564_v3  ;;  %4145 = vmatprep.mubr.msk.f32.mxu1 %vm527_vm2, %v1992_v43 }
 0x13f   : > { %4395 = vmatprep.subr.bf16.mxu1 %v4586_v14 }
 0x141   : > { %4146 = vmatmul.mubr.msk.f32.gmra.mrb[46].mxu1 %vm527_vm2, %v1993_v44 }
 0x142   : > { %4148 = vmatprep.mubr.msk.f32.mxu1 %vm527_vm2, %v1994_v56  ;;  %4397 = vmatpush3.bf16.msra.mxu1 %v4586_v14 }
 0x143   : > { %4407 = vmatprep.subr.bf16.mxu1 %v4564_v3 }
 0x145   : > { %4149 = vmatmul.mubr.msk.f32.gmra.mrb[48].mxu1 %vm527_vm2, %v1995_v57 }
 0x146   : > { %4151 = vmatprep.mubr.msk.f32.mxu1 %vm527_vm2, %v1996_v63 }
 0x149   : > { %4152 = vmatmul.mubr.msk.f32.gmra.mrb[50].mxu1 %vm527_vm2, %v1997_v2 }
 0x14a   : > { %4182 = vmatprep.mubr.msk.f32.mxu1 %vm527_vm2, %v2284_v4 }
 0x14d   : > { %4183 = vmatmul.mubr.msk.f32.vlgmr.msra.gmra.mrb[52].mxu1 %vm527_vm2, %v2285_v46 }
 0x14e   : > { %4409 = vmatpush3.bf16.msra.mxu1 %v4564_v3  ;;  %4185 = vmatprep.mubr.msk.f32.mxu1 %vm527_vm2, %v2286_v47 }
 0x14f   : > { %4411 = vmatprep.subr.bf16.mxu1 %v4586_v14 }
 0x151   : > { %4186 = vmatmul.mubr.msk.f32.gmra.mrb[54].mxu1 %vm527_vm2, %v2287_v5 }
 0x152   : > { %4188 = vmatprep.mubr.msk.f32.mxu1 %vm527_vm2, %v2288_v6  ;;  %4413 = vmatpush3.bf16.msra.mxu1 %v4586_v14 }
 0x153   : > { %4423 = vmatprep.subr.bf16.mxu1 %v4564_v3 }
 0x155   : > { %4189 = vmatmul.mubr.msk.f32.gmra.mrb[56].mxu1 %vm527_vm2, %v2289_v7 }
 0x156   : > { %4191 = vmatprep.mubr.msk.f32.mxu1 %vm527_vm2, %v2290_v13 }
 0x159   : > { %4192 = vmatmul.mubr.msk.f32.gmra.mrb[58].mxu1 %vm527_vm2, %v2291_v15 }
 0x15a   : > { %4222 = vmatprep.mubr.msk.f32.mxu1 %vm527_vm2, %v2578_v18 }
 0x15d   : > { %4223 = vmatmul.mubr.msk.f32.vlgmr.msra.gmra.mrb[60].mxu1 %vm527_vm2, %v2579_v48 }
 0x15e   : > { %4225 = vmatprep.mubr.msk.f32.mxu1 %vm527_vm2, %v2580_v19  ;;  %4425 = vmatpush3.bf16.msra.mxu1 %v4564_v3  ;;  %v2585_v3 = vmax.f32 %v4769_v42, 0.0  ;;  %v2875_v42 = vmax.f32 %v2867_v39, 0.0 }
 0x15f   : > { %4427 = vmatprep.subr.bf16.mxu1 %v4586_v14 }
 0x161   : > { %4226 = vmatmul.mubr.msk.f32.gmra.mrb[62].mxu1 %vm527_vm2, %v2581_v20 }
 0x162   : > { %4228 = vmatprep.mubr.msk.f32.mxu1 %vm527_vm2, %v2582_v22  ;;  %4429 = vmatpush3.bf16.msra.mxu1 %v4586_v14  ;;  %v2873_v14 = vmax.f32 %v2865_v36, 0.0 }
 0x165   : > { %4229 = vmatmul.mubr.msk.f32.gmra.mrb[64].mxu1 %vm527_vm2, %v2583_v25 }
 0x166   : > { %4231 = vmatprep.mubr.msk.f32.mxu1 %vm527_vm2, %v2584_v21 }
 0x169   : > { %4232 = vmatmul.mubr.msk.f32.gmra.mrb[66].mxu1 %vm527_vm2, %v2585_v3 }
 0x16a   : > { %4262 = vmatprep.mubr.msk.f32.mxu1 %vm527_vm2, %v2872_v38 }
 0x16d   : > { %4263 = vmatmul.mubr.msk.f32.vlgmr.msra.gmra.mrb[68].mxu1 %vm527_vm2, %v2873_v14 }
 0x16e   : > { %4265 = vmatprep.mubr.msk.f32.mxu1 %vm527_vm2, %v2874_v41 }
 0x171   : > { %4266 = vmatmul.mubr.msk.f32.gmra.mrb[70].mxu1 %vm527_vm2, %v2875_v42 }
 0x172   : > { %4268 = vmatprep.mubr.msk.f32.mxu1 %vm527_vm2, %v2876_v50 }
 0x175   : > { %4269 = vmatmul.mubr.msk.f32.gmra.mrb[72].mxu1 %vm527_vm2, %v2877_v51 }
 0x176   : > { %4271 = vmatprep.mubr.msk.f32.mxu1 %vm527_vm2, %v2878_v52 }
 0x179   : > { %4272 = vmatmul.mubr.msk.f32.gmra.mrb[74].mxu1 %vm527_vm2, %v2879_v31 }
 0x1c0   : > { %v3944_v40 = vpop.f32.mrb[4].mxu1 }
 0x1c1   : > { %v624_v53 = vadd.f32 %v3944_v40, %v4936_v28  ;;  %v618_v17 = vpop.f32.mrb[5].mxu1 }
 0x1c2   : > { %v619_v54 = vadd.f32 %v4936_v28, %v618_v17 }
 0x1c3   : > { %v658_v58 = vmax.f32 %v624_v53, 0.0 }
 0x1c4   : > { %v657_v37 = vmax.f32 %v619_v54, 0.0  ;;  %v3947_v55 = vpop.f32.mrb[6].mxu1 }
 0x1c5   : > { %v634_v59 = vadd.f32 %v3947_v55, %v4936_v28  ;;  %v628_v60 = vpop.f32.mrb[7].mxu1 }
 0x1c6   : > { %v629_v61 = vadd.f32 %v4936_v28, %v628_v60  ;;  %3962 = vmatprep.mubr.msk.f32.mxu0 %vm527_vm2, %v657_v37 }
 0x1c7   : > { %3963 = vmatmul.mubr.msk.f32.vlgmr.msra.gmra.mrb[4].mxu0 %vm527_vm2, %v658_v58  ;;  %v660_v10 = vmax.f32 %v634_v59, 0.0 }
 0x1c8   : > { %v659_v62 = vmax.f32 %v629_v61, 0.0  ;;  %4321 = vmatpush3.bf16.msra.mxu0 %v4781_v23  ;;  %v3950_v9 = vpop.f32.mrb[8].mxu1 }
 0x1c9   : > { %v644_v11 = vadd.f32 %v3950_v9, %v4936_v28  ;;  %v638_v12 = vpop.f32.mrb[9].mxu1  ;;  %4323 = vmatprep.subr.bf16.mxu0 %v4869_v45 }
 0x1ca   : > { %v639_v29 = vadd.f32 %v4936_v28, %v638_v12  ;;  %3965 = vmatprep.mubr.msk.f32.mxu0 %vm527_vm2, %v659_v62 }
 0x1cb   : > { %3966 = vmatmul.mubr.msk.f32.gmra.mrb[6].mxu0 %vm527_vm2, %v660_v10  ;;  %v662_v33 = vmax.f32 %v644_v11, 0.0 }
 0x1cc   : > { %v661_v30 = vmax.f32 %v639_v29, 0.0  ;;  %v3953_v8 = vpop.f32.mrb[10].mxu1  ;;  %4325 = vmatpush3.bf16.msra.mxu0 %v4869_v45 }
 0x1cd   : > { %v654_v34 = vadd.f32 %v3953_v8, %v4936_v28  ;;  %v648_v43 = vpop.f32.mrb[11].mxu1  ;;  %4335 = vmatprep.subr.bf16.mxu0 %v4781_v23 }
 0x1ce   : > { %v649_v44 = vadd.f32 %v4936_v28, %v648_v43  ;;  %3968 = vmatprep.mubr.msk.f32.mxu0 %vm527_vm2, %v661_v30 }
 0x1cf   : > { %3969 = vmatmul.mubr.msk.f32.gmra.mrb[8].mxu0 %vm527_vm2, %v662_v33  ;;  %v664_v63 = vmax.f32 %v654_v34, 0.0 }
 0x1d0   : > { %v663_v56 = vmax.f32 %v649_v44, 0.0  ;;  %v3984_v57 = vpop.f32.mrb[12].mxu1 }
 0x1d1   : > { %v918_v0 = vadd.f32 %v3984_v57, %v4936_v28  ;;  %v912_v1 = vpop.f32.mrb[13].mxu1 }
 0x1d2   : > { %v913_v2 = vadd.f32 %v4936_v28, %v912_v1  ;;  %3971 = vmatprep.mubr.msk.f32.mxu0 %vm527_vm2, %v663_v56 }
 0x1d3   : > { %3972 = vmatmul.mubr.msk.f32.gmra.mrb[10].mxu0 %vm527_vm2, %v664_v63  ;;  %v952_v47 = vmax.f32 %v918_v0, 0.0 }
 0x1d4   : > { %v951_v4 = vmax.f32 %v913_v2, 0.0  ;;  %v3987_v46 = vpop.f32.mrb[14].mxu1 }
 0x1d5   : > { %v928_v5 = vadd.f32 %v3987_v46, %v4936_v28  ;;  %v922_v6 = vpop.f32.mrb[15].mxu1 }
 0x1d6   : > { %v923_v7 = vadd.f32 %v4936_v28, %v922_v6  ;;  %4002 = vmatprep.mubr.msk.f32.mxu0 %vm527_vm2, %v951_v4 }
 0x1d7   : > { %4003 = vmatmul.mubr.msk.f32.vlgmr.msra.gmra.mrb[12].mxu0 %vm527_vm2, %v952_v47  ;;  %v954_v18 = vmax.f32 %v928_v5, 0.0 }
 0x1d8   : > { %v953_v13 = vmax.f32 %v923_v7, 0.0  ;;  %4337 = vmatpush3.bf16.msra.mxu0 %v4781_v23  ;;  %v3990_v15 = vpop.f32.mrb[16].mxu1 }
 0x1d9   : > { %v938_v48 = vadd.f32 %v3990_v15, %v4936_v28  ;;  %v932_v19 = vpop.f32.mrb[17].mxu1  ;;  %4339 = vmatprep.subr.bf16.mxu0 %v4869_v45 }
 0x1da   : > { %v933_v20 = vadd.f32 %v4936_v28, %v932_v19  ;;  %4005 = vmatprep.mubr.msk.f32.mxu0 %vm527_vm2, %v953_v13 }
 0x1db   : > { %4006 = vmatmul.mubr.msk.f32.gmra.mrb[14].mxu0 %vm527_vm2, %v954_v18  ;;  %v956_v25 = vmax.f32 %v938_v48, 0.0 }
 0x1dc   : > { %v955_v22 = vmax.f32 %v933_v20, 0.0  ;;  %v3993_v24 = vpop.f32.mrb[18].mxu1  ;;  %4341 = vmatpush3.bf16.msra.mxu0 %v4869_v45 }
 0x1dd   : > { %v948_v21 = vadd.f32 %v3993_v24, %v4936_v28  ;;  %v942_v49 = vpop.f32.mrb[19].mxu1  ;;  %4351 = vmatprep.subr.bf16.mxu0 %v4781_v23 }
 0x1de   : > { %v943_v3 = vadd.f32 %v4936_v28, %v942_v49  ;;  %4008 = vmatprep.mubr.msk.f32.mxu0 %vm527_vm2, %v955_v22 }
 0x1df   : > { %4009 = vmatmul.mubr.msk.f32.gmra.mrb[16].mxu0 %vm527_vm2, %v956_v25  ;;  %v958_v16 = vmax.f32 %v948_v21, 0.0 }
 0x1e0   : > { %v957_v36 = vmax.f32 %v943_v3, 0.0  ;;  %v4024_v38 = vpop.f32.mrb[20].mxu1 }
 0x1e1   : > { %v1212_v14 = vadd.f32 %v4024_v38, %v4936_v28  ;;  %v1206_v39 = vpop.f32.mrb[21].mxu1 }
 0x1e2   : > { %v1207_v41 = vadd.f32 %v4936_v28, %v1206_v39  ;;  %4011 = vmatprep.mubr.msk.f32.mxu0 %vm527_vm2, %v957_v36 }
 0x1e3   : > { %4012 = vmatmul.mubr.msk.f32.gmra.mrb[18].mxu0 %vm527_vm2, %v958_v16  ;;  %v1246_v26 = vmax.f32 %v1212_v14, 0.0 }
 0x1e4   : > { %v1245_v27 = vmax.f32 %v1207_v41, 0.0  ;;  %v4027_v42 = vpop.f32.mrb[22].mxu1 }
 0x1e5   : > { %v1222_v50 = vadd.f32 %v4027_v42, %v4936_v28  ;;  %v1216_v35 = vpop.f32.mrb[23].mxu1 }
 0x1e6   : > { %v1217_v51 = vadd.f32 %v4936_v28, %v1216_v35  ;;  %4042 = vmatprep.mubr.msk.f32.mxu0 %vm527_vm2, %v1245_v27 }
 0x1e7   : > { %4043 = vmatmul.mubr.msk.f32.vlgmr.msra.gmra.mrb[20].mxu0 %vm527_vm2, %v1246_v26  ;;  %v1248_v31 = vmax.f32 %v1222_v50, 0.0 }
 0x1e8   : > { %v1247_v32 = vmax.f32 %v1217_v51, 0.0  ;;  %4353 = vmatpush3.bf16.msra.mxu0 %v4781_v23  ;;  %v4030_v52 = vpop.f32.mrb[24].mxu1 }
 0x1e9   : > { %v1232_v40 = vadd.f32 %v4030_v52, %v4936_v28  ;;  %v1226_v53 = vpop.f32.mrb[25].mxu1  ;;  %4355 = vmatprep.subr.bf16.mxu0 %v4869_v45 }
 0x1ea   : > { %v1227_v17 = vadd.f32 %v4936_v28, %v1226_v53  ;;  %4045 = vmatprep.mubr.msk.f32.mxu0 %vm527_vm2, %v1247_v32 }
 0x1eb   : > { %4046 = vmatmul.mubr.msk.f32.gmra.mrb[22].mxu0 %vm527_vm2, %v1248_v31  ;;  %v1250_v55 = vmax.f32 %v1232_v40, 0.0 }
 0x1ec   : > { %v1249_v54 = vmax.f32 %v1227_v17, 0.0  ;;  %v4033_v37 = vpop.f32.mrb[26].mxu1  ;;  %4357 = vmatpush3.bf16.msra.mxu0 %v4869_v45 }
 0x1ed   : > { %v1242_v58 = vadd.f32 %v4033_v37, %v4936_v28  ;;  %v1236_v59 = vpop.f32.mrb[27].mxu1  ;;  %4367 = vmatprep.subr.bf16.mxu0 %v4781_v23 }
 0x1ee   : > { %v1237_v60 = vadd.f32 %v4936_v28, %v1236_v59  ;;  %4048 = vmatprep.mubr.msk.f32.mxu0 %vm527_vm2, %v1249_v54 }
 0x1ef   : > { %4049 = vmatmul.mubr.msk.f32.gmra.mrb[24].mxu0 %vm527_vm2, %v1250_v55  ;;  %v1252_v9 = vmax.f32 %v1242_v58, 0.0 }
 0x1f0   : > { %v1251_v61 = vmax.f32 %v1237_v60, 0.0  ;;  %v4064_v62 = vpop.f32.mrb[28].mxu1 }
 0x1f1   : > { %v1506_v10 = vadd.f32 %v4064_v62, %v4936_v28  ;;  %v1500_v11 = vpop.f32.mrb[29].mxu1 }
 0x1f2   : > { %v1501_v12 = vadd.f32 %v4936_v28, %v1500_v11  ;;  %4051 = vmatprep.mubr.msk.f32.mxu0 %vm527_vm2, %v1251_v61 }
 0x1f3   : > { %4052 = vmatmul.mubr.msk.f32.gmra.mrb[26].mxu0 %vm527_vm2, %v1252_v9  ;;  %v1540_v8 = vmax.f32 %v1506_v10, 0.0 }
 0x1f4   : > { %v1539_v29 = vmax.f32 %v1501_v12, 0.0  ;;  %v4067_v30 = vpop.f32.mrb[30].mxu1 }
 0x1f5   : > { %v1516_v33 = vadd.f32 %v4067_v30, %v4936_v28  ;;  %v1510_v34 = vpop.f32.mrb[31].mxu1 }
 0x1f6   : > { %v1511_v43 = vadd.f32 %v4936_v28, %v1510_v34  ;;  %4082 = vmatprep.mubr.msk.f32.mxu0 %vm527_vm2, %v1539_v29 }
 0x1f7   : > { %4083 = vmatmul.mubr.msk.f32.vlgmr.msra.gmra.mrb[28].mxu0 %vm527_vm2, %v1540_v8  ;;  %v1542_v57 = vmax.f32 %v1516_v33, 0.0 }
 0x1f8   : > { %v1541_v44 = vmax.f32 %v1511_v43, 0.0  ;;  %4369 = vmatpush3.bf16.msra.mxu0 %v4781_v23  ;;  %v4070_v56 = vpop.f32.mrb[32].mxu1 }
 0x1f9   : > { %v1526_v63 = vadd.f32 %v4070_v56, %v4936_v28  ;;  %v1520_v0 = vpop.f32.mrb[33].mxu1  ;;  %4371 = vmatprep.subr.bf16.mxu0 %v4869_v45 }
 0x1fa   : > { %v1521_v1 = vadd.f32 %v4936_v28, %v1520_v0  ;;  %4085 = vmatprep.mubr.msk.f32.mxu0 %vm527_vm2, %v1541_v44 }
 0x1fb   : > { %4086 = vmatmul.mubr.msk.f32.gmra.mrb[30].mxu0 %vm527_vm2, %v1542_v57  ;;  %v1544_v46 = vmax.f32 %v1526_v63, 0.0 }
 0x1fc   : > { %v1543_v2 = vmax.f32 %v1521_v1, 0.0  ;;  %v4073_v4 = vpop.f32.mrb[34].mxu1  ;;  %4373 = vmatpush3.bf16.msra.mxu0 %v4869_v45 }
 0x1fd   : > { %v1536_v47 = vadd.f32 %v4073_v4, %v4936_v28  ;;  %v1530_v5 = vpop.f32.mrb[35].mxu1  ;;  %4383 = vmatprep.subr.bf16.mxu0 %v4781_v23 }
 0x1fe   : > { %v1531_v6 = vadd.f32 %v4936_v28, %v1530_v5  ;;  %4088 = vmatprep.mubr.msk.f32.mxu0 %vm527_vm2, %v1543_v2 }
 0x1ff   : > { %4089 = vmatmul.mubr.msk.f32.gmra.mrb[32].mxu0 %vm527_vm2, %v1544_v46  ;;  %v1546_v15 = vmax.f32 %v1536_v47, 0.0 }
 0x200   : > { %v1545_v7 = vmax.f32 %v1531_v6, 0.0  ;;  %v4104_v13 = vpop.f32.mrb[36].mxu1 }
 0x201   : > { %v1800_v18 = vadd.f32 %v4104_v13, %v4936_v28  ;;  %v1794_v48 = vpop.f32.mrb[37].mxu1 }
 0x202   : > { %v1795_v19 = vadd.f32 %v4936_v28, %v1794_v48  ;;  %4091 = vmatprep.mubr.msk.f32.mxu0 %vm527_vm2, %v1545_v7 }
 0x203   : > { %4092 = vmatmul.mubr.msk.f32.gmra.mrb[34].mxu0 %vm527_vm2, %v1546_v15  ;;  %v1834_v24 = vmax.f32 %v1800_v18, 0.0 }
 0x204   : > { %v1833_v20 = vmax.f32 %v1795_v19, 0.0  ;;  %v4107_v22 = vpop.f32.mrb[38].mxu1 }
 0x205   : > { %v1810_v25 = vadd.f32 %v4107_v22, %v4936_v28  ;;  %v1804_v21 = vpop.f32.mrb[39].mxu1 }
 0x206   : > { %v1805_v49 = vadd.f32 %v4936_v28, %v1804_v21  ;;  %4122 = vmatprep.mubr.msk.f32.mxu0 %vm527_vm2, %v1833_v20 }
 0x207   : > { %4123 = vmatmul.mubr.msk.f32.vlgmr.msra.gmra.mrb[36].mxu0 %vm527_vm2, %v1834_v24  ;;  %v1836_v38 = vmax.f32 %v1810_v25, 0.0 }
 0x208   : > { %v1835_v3 = vmax.f32 %v1805_v49, 0.0  ;;  %4385 = vmatpush3.bf16.msra.mxu0 %v4781_v23  ;;  %v4110_v36 = vpop.f32.mrb[40].mxu1 }
 0x209   : > { %v1820_v16 = vadd.f32 %v4110_v36, %v4936_v28  ;;  %v1814_v14 = vpop.f32.mrb[41].mxu1  ;;  %4387 = vmatprep.subr.bf16.mxu0 %v4869_v45 }
 0x20a   : > { %v1815_v39 = vadd.f32 %v4936_v28, %v1814_v14  ;;  %4125 = vmatprep.mubr.msk.f32.mxu0 %vm527_vm2, %v1835_v3 }
 0x20b   : > { %4126 = vmatmul.mubr.msk.f32.gmra.mrb[38].mxu0 %vm527_vm2, %v1836_v38  ;;  %v1838_v42 = vmax.f32 %v1820_v16, 0.0 }
 0x20c   : > { %v1837_v41 = vmax.f32 %v1815_v39, 0.0  ;;  %v4113_v27 = vpop.f32.mrb[42].mxu1  ;;  %4389 = vmatpush3.bf16.msra.mxu0 %v4869_v45 }
 0x20d   : > { %v1830_v26 = vadd.f32 %v4113_v27, %v4936_v28  ;;  %v1824_v50 = vpop.f32.mrb[43].mxu1  ;;  %4399 = vmatprep.subr.bf16.mxu0 %v4781_v23 }
 0x20e   : > { %v1825_v35 = vadd.f32 %v4936_v28, %v1824_v50  ;;  %4128 = vmatprep.mubr.msk.f32.mxu0 %vm527_vm2, %v1837_v41 }
 0x20f   : > { %4129 = vmatmul.mubr.msk.f32.gmra.mrb[40].mxu0 %vm527_vm2, %v1838_v42  ;;  %v1840_v52 = vmax.f32 %v1830_v26, 0.0 }
 0x210   : > { %v1839_v51 = vmax.f32 %v1825_v35, 0.0  ;;  %v4144_v32 = vpop.f32.mrb[44].mxu1 }
 0x211   : > { %v2094_v31 = vadd.f32 %v4144_v32, %v4936_v28  ;;  %v2088_v40 = vpop.f32.mrb[45].mxu1 }
 0x212   : > { %v2089_v53 = vadd.f32 %v4936_v28, %v2088_v40  ;;  %4131 = vmatprep.mubr.msk.f32.mxu0 %vm527_vm2, %v1839_v51 }
 0x213   : > { %4132 = vmatmul.mubr.msk.f32.gmra.mrb[42].mxu0 %vm527_vm2, %v1840_v52  ;;  %v2128_v37 = vmax.f32 %v2094_v31, 0.0 }
 0x214   : > { %v2127_v17 = vmax.f32 %v2089_v53, 0.0  ;;  %v4147_v54 = vpop.f32.mrb[46].mxu1 }
 0x215   : > { %v2104_v55 = vadd.f32 %v4147_v54, %v4936_v28  ;;  %v2098_v58 = vpop.f32.mrb[47].mxu1 }
 0x216   : > { %v2099_v59 = vadd.f32 %v4936_v28, %v2098_v58  ;;  %4162 = vmatprep.mubr.msk.f32.mxu0 %vm527_vm2, %v2127_v17 }
 0x217   : > { %4163 = vmatmul.mubr.msk.f32.vlgmr.msra.gmra.mrb[44].mxu0 %vm527_vm2, %v2128_v37  ;;  %v2130_v62 = vmax.f32 %v2104_v55, 0.0 }
 0x218   : > { %v2129_v60 = vmax.f32 %v2099_v59, 0.0  ;;  %4401 = vmatpush3.bf16.msra.mxu0 %v4781_v23  ;;  %v4150_v61 = vpop.f32.mrb[48].mxu1 }
 0x219   : > { %v2114_v9 = vadd.f32 %v4150_v61, %v4936_v28  ;;  %v2108_v10 = vpop.f32.mrb[49].mxu1  ;;  %4403 = vmatprep.subr.bf16.mxu0 %v4869_v45 }
 0x21a   : > { %v2109_v11 = vadd.f32 %v4936_v28, %v2108_v10  ;;  %4165 = vmatprep.mubr.msk.f32.mxu0 %vm527_vm2, %v2129_v60 }
 0x21b   : > { %4166 = vmatmul.mubr.msk.f32.gmra.mrb[46].mxu0 %vm527_vm2, %v2130_v62  ;;  %v2132_v30 = vmax.f32 %v2114_v9, 0.0 }
 0x21c   : > { %v2131_v12 = vmax.f32 %v2109_v11, 0.0  ;;  %v4153_v29 = vpop.f32.mrb[50].mxu1  ;;  %4405 = vmatpush3.bf16.msra.mxu0 %v4869_v45 }
 0x21d   : > { %v2124_v8 = vadd.f32 %v4153_v29, %v4936_v28  ;;  %v2118_v33 = vpop.f32.mrb[51].mxu1  ;;  %4415 = vmatprep.subr.bf16.mxu0 %v4781_v23 }
 0x21e   : > { %v2119_v34 = vadd.f32 %v4936_v28, %v2118_v33  ;;  %4168 = vmatprep.mubr.msk.f32.mxu0 %vm527_vm2, %v2131_v12 }
 0x21f   : > { %4169 = vmatmul.mubr.msk.f32.gmra.mrb[48].mxu0 %vm527_vm2, %v2132_v30  ;;  %v2134_v56 = vmax.f32 %v2124_v8, 0.0 }
 0x220   : > { %v2133_v43 = vmax.f32 %v2119_v34, 0.0  ;;  %v4184_v44 = vpop.f32.mrb[52].mxu1 }
 0x221   : > { %v2388_v57 = vadd.f32 %v4184_v44, %v4936_v28  ;;  %v2382_v63 = vpop.f32.mrb[53].mxu1 }
 0x222   : > { %v2383_v0 = vadd.f32 %v4936_v28, %v2382_v63  ;;  %4171 = vmatprep.mubr.msk.f32.mxu0 %vm527_vm2, %v2133_v43 }
 0x223   : > { %4172 = vmatmul.mubr.msk.f32.gmra.mrb[50].mxu0 %vm527_vm2, %v2134_v56  ;;  %v2422_v4 = vmax.f32 %v2388_v57, 0.0 }
 0x224   : > { %v2421_v1 = vmax.f32 %v2383_v0, 0.0  ;;  %v4187_v2 = vpop.f32.mrb[54].mxu1 }
 0x225   : > { %v2398_v46 = vadd.f32 %v4187_v2, %v4936_v28  ;;  %v2392_v47 = vpop.f32.mrb[55].mxu1 }
 0x226   : > { %v2393_v5 = vadd.f32 %v4936_v28, %v2392_v47  ;;  %4202 = vmatprep.mubr.msk.f32.mxu0 %vm527_vm2, %v2421_v1 }
 0x227   : > { %4203 = vmatmul.mubr.msk.f32.vlgmr.msra.gmra.mrb[52].mxu0 %vm527_vm2, %v2422_v4  ;;  %v2424_v13 = vmax.f32 %v2398_v46, 0.0 }
 0x228   : > { %v2423_v6 = vmax.f32 %v2393_v5, 0.0  ;;  %4417 = vmatpush3.bf16.msra.mxu0 %v4781_v23  ;;  %v4190_v7 = vpop.f32.mrb[56].mxu1 }
 0x229   : > { %v2408_v15 = vadd.f32 %v4190_v7, %v4936_v28  ;;  %v2402_v18 = vpop.f32.mrb[57].mxu1  ;;  %4419 = vmatprep.subr.bf16.mxu0 %v4869_v45 }
 0x22a   : > { %v2403_v48 = vadd.f32 %v4936_v28, %v2402_v18  ;;  %4205 = vmatprep.mubr.msk.f32.mxu0 %vm527_vm2, %v2423_v6 }
 0x22b   : > { %4206 = vmatmul.mubr.msk.f32.gmra.mrb[54].mxu0 %vm527_vm2, %v2424_v13  ;;  %v2426_v22 = vmax.f32 %v2408_v15, 0.0 }
 0x22c   : > { %v2425_v19 = vmax.f32 %v2403_v48, 0.0  ;;  %v4193_v20 = vpop.f32.mrb[58].mxu1  ;;  %4421 = vmatpush3.bf16.msra.mxu0 %v4869_v45 }
 0x22d   : > { %v2418_v24 = vadd.f32 %v4193_v20, %v4936_v28  ;;  %v2412_v25 = vpop.f32.mrb[59].mxu1  ;;  %4431 = vmatprep.subr.bf16.mxu0 %v4781_v23 }
 0x22e   : > { %v2413_v21 = vadd.f32 %v4936_v28, %v2412_v25  ;;  %4208 = vmatprep.mubr.msk.f32.mxu0 %vm527_vm2, %v2425_v19  ;;  %v5132_v19 = vld [vmem:[%s5387_s6] ss:$0 sm:$0xff] }
 0x22f   : > { %4209 = vmatmul.mubr.msk.f32.gmra.mrb[56].mxu0 %vm527_vm2, %v2426_v22  ;;  %v2428_v36 = vmax.f32 %v2418_v24, 0.0 }
 0x230   : > { %v2427_v49 = vmax.f32 %v2413_v21, 0.0  ;;  %v4224_v3 = vpop.f32.mrb[60].mxu1 }
 0x231   : > { %v2682_v38 = vadd.f32 %v4224_v3, %v4936_v28  ;;  %v2676_v16 = vpop.f32.mrb[61].mxu1 }
 0x232   : > { %v2677_v14 = vadd.f32 %v4936_v28, %v2676_v16  ;;  %4211 = vmatprep.mubr.msk.f32.mxu0 %vm527_vm2, %v2427_v49 }
 0x233   : > { %4212 = vmatmul.mubr.msk.f32.gmra.mrb[58].mxu0 %vm527_vm2, %v2428_v36  ;;  %v2716_v27 = vmax.f32 %v2682_v38, 0.0 }
 0x234   : > { %v2715_v39 = vmax.f32 %v2677_v14, 0.0  ;;  %v4227_v41 = vpop.f32.mrb[62].mxu1 }
 0x235   : > { %v2692_v42 = vadd.f32 %v4227_v41, %v4936_v28  ;;  %v2686_v26 = vpop.f32.mrb[63].mxu1 }
 0x236   : > { %v2687_v50 = vadd.f32 %v4936_v28, %v2686_v26  ;;  %4242 = vmatprep.mubr.msk.f32.mxu0 %vm527_vm2, %v2715_v39 }
 0x237   : > { %4243 = vmatmul.mubr.msk.f32.vlgmr.msra.gmra.mrb[60].mxu0 %vm527_vm2, %v2716_v27  ;;  %v2718_v32 = vmax.f32 %v2692_v42, 0.0 }
 0x238   : > { %v2717_v35 = vmax.f32 %v2687_v50, 0.0  ;;  %v4230_v51 = vpop.f32.mrb[64].mxu1  ;;  %4433 = vmatpush3.bf16.msra.mxu0 %v4781_v23 }
 0x239   : > { %v2702_v52 = vadd.f32 %v4230_v51, %v4936_v28  ;;  %v2696_v31 = vpop.f32.mrb[65].mxu1  ;;  %4435 = vmatprep.subr.bf16.mxu0 %v4869_v45 }
 0x23a   : > { %v2697_v40 = vadd.f32 %v4936_v28, %v2696_v31  ;;  %4245 = vmatprep.mubr.msk.f32.mxu0 %vm527_vm2, %v2717_v35 }
 0x23b   : > { %4246 = vmatmul.mubr.msk.f32.gmra.mrb[62].mxu0 %vm527_vm2, %v2718_v32  ;;  %v2720_v54 = vmax.f32 %v2702_v52, 0.0 }
 0x23c   : > { %v2719_v53 = vmax.f32 %v2697_v40, 0.0  ;;  %v4233_v17 = vpop.f32.mrb[66].mxu1  ;;  %4437 = vmatpush3.bf16.msra.mxu0 %v4869_v45 }
 0x23d   : > { %v2712_v37 = vadd.f32 %v4233_v17, %v4936_v28  ;;  %v2706_v23 = vpop.f32.mrb[67].mxu1 }
 0x23e   : > { %v2707_v55 = vadd.f32 %v4936_v28, %v2706_v23  ;;  %4248 = vmatprep.mubr.msk.f32.mxu0 %vm527_vm2, %v2719_v53 }
 0x23f   : > { %4249 = vmatmul.mubr.msk.f32.gmra.mrb[64].mxu0 %vm527_vm2, %v2720_v54  ;;  %v2722_v60 = vmax.f32 %v2712_v37, 0.0 }
 0x240   : > { %v2721_v58 = vmax.f32 %v2707_v55, 0.0  ;;  %v4264_v59 = vpop.f32.mrb[68].mxu1 }
 0x241   : > { %v2976_v61 = vadd.f32 %v4264_v59, %v4936_v28  ;;  %v2970_v62 = vpop.f32.mrb[69].mxu1 }
 0x242   : > { %v2971_v9 = vadd.f32 %v4936_v28, %v2970_v62  ;;  %4251 = vmatprep.mubr.msk.f32.mxu0 %vm527_vm2, %v2721_v58 }
 0x243   : > { %4252 = vmatmul.mubr.msk.f32.gmra.mrb[66].mxu0 %vm527_vm2, %v2722_v60  ;;  %v3010_v11 = vmax.f32 %v2976_v61, 0.0 }
 0x244   : > { %v3009_v45 = vmax.f32 %v2971_v9, 0.0  ;;  %v4267_v10 = vpop.f32.mrb[70].mxu1 }
 0x245   : > { %v2986_v12 = vadd.f32 %v4267_v10, %v4936_v28  ;;  %v2980_v29 = vpop.f32.mrb[71].mxu1 }
 0x246   : > { %v2981_v30 = vadd.f32 %v4936_v28, %v2980_v29  ;;  %4282 = vmatprep.mubr.msk.f32.mxu0 %vm527_vm2, %v3009_v45 }
 0x247   : > { %4283 = vmatmul.mubr.msk.f32.vlgmr.msra.gmra.mrb[68].mxu0 %vm527_vm2, %v3010_v11  ;;  %v3012_v34 = vmax.f32 %v2986_v12, 0.0 }
 0x248   : > { %v3011_v8 = vmax.f32 %v2981_v30, 0.0  ;;  %v4270_v33 = vpop.f32.mrb[72].mxu1 }
 0x249   : > { %v2996_v43 = vadd.f32 %v4270_v33, %v4936_v28  ;;  %v2990_v44 = vpop.f32.mrb[73].mxu1 }
 0x24a   : > { %v2991_v56 = vadd.f32 %v4936_v28, %v2990_v44  ;;  %4285 = vmatprep.mubr.msk.f32.mxu0 %vm527_vm2, %v3011_v8 }
 0x24b   : > { %4286 = vmatmul.mubr.msk.f32.gmra.mrb[70].mxu0 %vm527_vm2, %v3012_v34  ;;  %v3014_v0 = vmax.f32 %v2996_v43, 0.0 }
 0x24c   : > { %v3013_v57 = vmax.f32 %v2991_v56, 0.0  ;;  %v4273_v63 = vpop.f32.mrb[74].mxu1 }
 0x24d   : > { %v3006_v1 = vadd.f32 %v4273_v63, %v4936_v28  ;;  %v3000_v2 = vpop.f32.mrb[75].mxu1 }
 0x24e   : > { %v3001_v4 = vadd.f32 %v4936_v28, %v3000_v2  ;;  %4288 = vmatprep.mubr.msk.f32.mxu0 %vm527_vm2, %v3013_v57 }
 0x24f   : > { %4289 = vmatmul.mubr.msk.f32.gmra.mrb[72].mxu0 %vm527_vm2, %v3014_v0  ;;  %v3016_v47 = vmax.f32 %v3006_v1, 0.0 }
 0x250   : > { %v3015_v46 = vmax.f32 %v3001_v4, 0.0 }
 0x252   : > { %4291 = vmatprep.mubr.msk.f32.mxu0 %vm527_vm2, %v3015_v46 }
 0x253   : > { %4292 = vmatmul.mubr.msk.f32.gmra.mrb[74].mxu0 %vm527_vm2, %v3016_v47 }
 0x29a   : > { %v5113_v5 = vpop.f32.mrb[4].mxu0 }
 0x29b   : > { %v5115_v6 = vpop.f32.mrb[5].mxu0 }
 0x29e   : > { %v5117_v7 = vpop.f32.mrb[6].mxu0 }
 0x29f   : > { %v5119_v13 = vpop.f32.mrb[7].mxu0 }
 0x2a2   : > { %v5121_v15 = vpop.f32.mrb[8].mxu0 }
 0x2a3   : > { %v5123_v28 = vpop.f32.mrb[9].mxu0 }
 0x2a6   : > { %v5125_v18 = vpop.f32.mrb[10].mxu0 }
 0x2a7   : > { %v5127_v48 = vpop.f32.mrb[11].mxu0 }
 0x2aa   : > { %v4004_v20 = vpop.f32.mrb[12].mxu0 }
 0x2ab   : > { %v1055_v22 = vadd.f32 %v4004_v20, %v5132_v19  ;;  %v1049_v24 = vpop.f32.mrb[13].mxu0 }
 0x2ac   : > { %v1050_v21 = vadd.f32 %v5132_v19, %v1049_v24 }
 0x2ad   : > { %v1089_v25 = vmax.f32 %v1055_v22, 0.0 }
 0x2ae   : > { %v4007_v49 = vpop.f32.mrb[14].mxu0  ;;  %v1088_v38 = vmax.f32 %v1050_v21, 0.0 }
 0x2af   : > { %v1065_v3 = vadd.f32 %v4007_v49, %v5132_v19  ;;  %3164 = vrot.lane.b32.xlu0 %v1089_v25, %s4492_s16  ;;  %v1059_v36 = vpop.f32.mrb[15].mxu0 }
 0x2b0   : > { %v1060_v14 = vadd.f32 %v5132_v19, %v1059_v36 }
 0x2b1   : > { %v1091_v16 = vmax.f32 %v1065_v3, 0.0 }
 0x2b2   : > { %v4010_v39 = vpop.f32.mrb[16].mxu0  ;;  %v1090_v42 = vmax.f32 %v1060_v14, 0.0 }
 0x2b3   : > { %3168 = vrot.lane.b32.xlu1 %v1091_v16, %s4492_s16  ;;  %v1069_v41 = vpop.f32.mrb[17].mxu0  ;;  %3162 = vrot.lane.b32.xlu0 %v1088_v38, %s4492_s16  ;;  %v1075_v26 = vadd.f32 %v4010_v39, %v5132_v19 }
 0x2b4   : > { %v1070_v27 = vadd.f32 %v5132_v19, %v1069_v41 }
 0x2b5   : > { %v1093_v52 = vmax.f32 %v1075_v26, 0.0 }
 0x2b6   : > { %v1092_v50 = vmax.f32 %v1070_v27, 0.0  ;;  %v4013_v35 = vpop.f32.mrb[18].mxu0 }
 0x2b7   : > { %v1079_v51 = vpop.f32.mrb[19].mxu0  ;;  %3166 = vrot.lane.b32.xlu1 %v1090_v42, %s4492_s16  ;;  %v1085_v31 = vadd.f32 %v4013_v35, %v5132_v19 }
 0x2b8   : > { %v1080_v32 = vadd.f32 %v5132_v19, %v1079_v51  ;;  %3170 = vrot.lane.b32.xlu0 %v1092_v50, %s4492_s16 }
 0x2b9   : > { %v1095_v37 = vmax.f32 %v1085_v31, 0.0 }
 0x2ba   : > { %v1094_v40 = vmax.f32 %v1080_v32, 0.0  ;;  %v4044_v53 = vpop.f32.mrb[20].mxu0 }
 0x2bb   : > { %v1343_v17 = vpop.f32.mrb[21].mxu0  ;;  %3172 = vrot.lane.b32.xlu1 %v1093_v52, %s4492_s16  ;;  %v1349_v23 = vadd.f32 %v4044_v53, %v5132_v19 }
 0x2bc   : > { %v1344_v54 = vadd.f32 %v5132_v19, %v1343_v17  ;;  %3174 = vrot.lane.b32.xlu0 %v1094_v40, %s4492_s16 }
 0x2bd   : > { %v1383_v61 = vmax.f32 %v1349_v23, 0.0 }
 0x2be   : > { %v1382_v55 = vmax.f32 %v1344_v54, 0.0  ;;  %v4047_v58 = vpop.f32.mrb[22].mxu0 }
 0x2bf   : > { %v1353_v59 = vpop.f32.mrb[23].mxu0  ;;  %3176 = vrot.lane.b32.xlu1 %v1095_v37, %s4492_s16  ;;  %v1359_v62 = vadd.f32 %v4047_v58, %v5132_v19 }
 0x2c0   : > { %v1354_v60 = vadd.f32 %v5132_v19, %v1353_v59  ;;  %3194 = vrot.lane.b32.xlu0 %v1382_v55, %s4493_s17 }
 0x2c1   : > { %v1385_v12 = vmax.f32 %v1359_v62, 0.0 }
 0x2c2   : > { %v1384_v9 = vmax.f32 %v1354_v60, 0.0  ;;  %v4050_v45 = vpop.f32.mrb[24].mxu0 }
 0x2c3   : > { %v1363_v10 = vpop.f32.mrb[25].mxu0  ;;  %3196 = vrot.lane.b32.xlu1 %v1383_v61, %s4493_s17  ;;  %v1369_v29 = vadd.f32 %v4050_v45, %v5132_v19 }
 0x2c4   : > { %v1364_v11 = vadd.f32 %v5132_v19, %v1363_v10  ;;  %3198 = vrot.lane.b32.xlu0 %v1384_v9, %s4493_s17 }
 0x2c5   : > { %v1387_v43 = vmax.f32 %v1369_v29, 0.0 }
 0x2c6   : > { %v1386_v30 = vmax.f32 %v1364_v11, 0.0  ;;  %v4053_v8 = vpop.f32.mrb[26].mxu0 }
 0x2c7   : > { %v1373_v33 = vpop.f32.mrb[27].mxu0  ;;  %3200 = vrot.lane.b32.xlu1 %v1385_v12, %s4493_s17  ;;  %v1379_v44 = vadd.f32 %v4053_v8, %v5132_v19 }
 0x2c8   : > { %v1374_v34 = vadd.f32 %v5132_v19, %v1373_v33  ;;  %3202 = vrot.lane.b32.xlu0 %v1386_v30, %s4493_s17 }
 0x2c9   : > { %v1389_v1 = vmax.f32 %v1379_v44, 0.0 }
 0x2ca   : > { %v1388_v56 = vmax.f32 %v1374_v34, 0.0  ;;  %v4084_v57 = vpop.f32.mrb[28].mxu0 }
 0x2cb   : > { %v1637_v63 = vpop.f32.mrb[29].mxu0  ;;  %3204 = vrot.lane.b32.xlu1 %v1387_v43, %s4493_s17  ;;  %v1643_v2 = vadd.f32 %v4084_v57, %v5132_v19 }
 0x2cc   : > { %v1638_v0 = vadd.f32 %v5132_v19, %v1637_v63  ;;  %3206 = vrot.lane.b32.xlu0 %v1388_v56, %s4493_s17 }
 0x2cd   : > { %v1677_v22 = vmax.f32 %v1643_v2, 0.0 }
 0x2ce   : > { %v1676_v4 = vmax.f32 %v1638_v0, 0.0  ;;  %v4087_v46 = vpop.f32.mrb[30].mxu0 }
 0x2cf   : > { %v1647_v47 = vpop.f32.mrb[31].mxu0  ;;  %3208 = vrot.lane.b32.xlu1 %v1389_v1, %s4493_s17  ;;  %v1653_v24 = vadd.f32 %v4087_v46, %v5132_v19 }
 0x2d0   : > { %v1648_v20 = vadd.f32 %v5132_v19, %v1647_v47  ;;  %3226 = vrot.lane.b32.xlu0 %v1676_v4, %s4494_s18 }
 0x2d1   : > { %v1679_v36 = vmax.f32 %v1653_v24, 0.0 }
 0x2d2   : > { %v1678_v25 = vmax.f32 %v1648_v20, 0.0  ;;  %v4090_v21 = vpop.f32.mrb[32].mxu0 }
 0x2d3   : > { %v1657_v49 = vpop.f32.mrb[33].mxu0  ;;  %3228 = vrot.lane.b32.xlu1 %v1677_v22, %s4494_s18  ;;  %v1663_v38 = vadd.f32 %v4090_v21, %v5132_v19 }
 0x2d4   : > { %v1658_v3 = vadd.f32 %v5132_v19, %v1657_v49  ;;  %3230 = vrot.lane.b32.xlu0 %v1678_v25, %s4494_s18 }
 0x2d5   : > { %v1681_v27 = vmax.f32 %v1663_v38, 0.0 }
 0x2d6   : > { %v1680_v16 = vmax.f32 %v1658_v3, 0.0  ;;  %v4093_v14 = vpop.f32.mrb[34].mxu0 }
 0x2d7   : > { %v1667_v39 = vpop.f32.mrb[35].mxu0  ;;  %3232 = vrot.lane.b32.xlu1 %v1679_v36, %s4494_s18  ;;  %v1673_v42 = vadd.f32 %v4093_v14, %v5132_v19 }
 0x2d8   : > { %v1668_v41 = vadd.f32 %v5132_v19, %v1667_v39  ;;  %3234 = vrot.lane.b32.xlu0 %v1680_v16, %s4494_s18 }
 0x2d9   : > { %v1683_v51 = vmax.f32 %v1673_v42, 0.0 }
 0x2da   : > { %v1682_v26 = vmax.f32 %v1668_v41, 0.0  ;;  %v5179_v50 = vpop.f32.mrb[36].mxu0 }
 0x2db   : > { %v5181_v35 = vpop.f32.mrb[37].mxu0  ;;  %3236 = vrot.lane.b32.xlu1 %v1681_v27, %s4494_s18 }
 0x2dc   : > { %3238 = vrot.lane.b32.xlu0 %v1682_v26, %s4494_s18 }
 0x2de   : > { %v5185_v32 = vpop.f32.mrb[38].mxu0 }
 0x2df   : > { %v5187_v52 = vpop.f32.mrb[39].mxu0  ;;  %3240 = vrot.lane.b32.xlu1 %v1683_v51, %s4494_s18 }
 0x2e2   : > { %v5190_v31 = vpop.f32.mrb[40].mxu0 }
 0x2e3   : > { %v5192_v40 = vpop.f32.mrb[41].mxu0 }
 0x2e6   : > { %v5194_v53 = vpop.f32.mrb[42].mxu0 }
 0x2e7   : > { %v5196_v17 = vpop.f32.mrb[43].mxu0 }
 0x2ea   : > { %v4164_v54 = vpop.f32.mrb[44].mxu0 }
 0x2eb   : > { %v2231_v37 = vadd.f32 %v4164_v54, %v5132_v19  ;;  %v2225_v23 = vpop.f32.mrb[45].mxu0 }
 0x2ec   : > { %v2226_v55 = vadd.f32 %v5132_v19, %v2225_v23 }
 0x2ed   : > { %v2265_v58 = vmax.f32 %v2231_v37, 0.0 }
 0x2ee   : > { %v2264_v59 = vmax.f32 %v2226_v55, 0.0  ;;  %v4167_v60 = vpop.f32.mrb[46].mxu0 }
 0x2ef   : > { %v2241_v61 = vadd.f32 %v4167_v60, %v5132_v19  ;;  %v2235_v62 = vpop.f32.mrb[47].mxu0  ;;  %3260 = vrot.lane.b32.xlu1 %v2265_v58, %s4492_s16 }
 0x2f0   : > { %v2236_v9 = vadd.f32 %v5132_v19, %v2235_v62  ;;  %3258 = vrot.lane.b32.xlu0 %v2264_v59, %s4492_s16 }
 0x2f1   : > { %v2267_v45 = vmax.f32 %v2241_v61, 0.0 }
 0x2f2   : > { %v2266_v10 = vmax.f32 %v2236_v9, 0.0  ;;  %v4170_v11 = vpop.f32.mrb[48].mxu0 }
 0x2f3   : > { %v2251_v12 = vadd.f32 %v4170_v11, %v5132_v19  ;;  %v2245_v29 = vpop.f32.mrb[49].mxu0  ;;  %3264 = vrot.lane.b32.xlu1 %v2267_v45, %s4492_s16 }
 0x2f4   : > { %v2246_v30 = vadd.f32 %v5132_v19, %v2245_v29  ;;  %3262 = vrot.lane.b32.xlu0 %v2266_v10, %s4492_s16 }
 0x2f5   : > { %v2269_v8 = vmax.f32 %v2251_v12, 0.0 }
 0x2f6   : > { %v2268_v33 = vmax.f32 %v2246_v30, 0.0  ;;  %v4173_v34 = vpop.f32.mrb[50].mxu0 }
 0x2f7   : > { %v2261_v43 = vadd.f32 %v4173_v34, %v5132_v19  ;;  %v2255_v44 = vpop.f32.mrb[51].mxu0  ;;  %3268 = vrot.lane.b32.xlu1 %v2269_v8, %s4492_s16 }
 0x2f8   : > { %v2256_v56 = vadd.f32 %v5132_v19, %v2255_v44  ;;  %3266 = vrot.lane.b32.xlu0 %v2268_v33, %s4492_s16 }
 0x2f9   : > { %v2271_v57 = vmax.f32 %v2261_v43, 0.0 }
 0x2fa   : > { %v2270_v63 = vmax.f32 %v2256_v56, 0.0  ;;  %v4204_v0 = vpop.f32.mrb[52].mxu0 }
 0x2fb   : > { %v2525_v1 = vadd.f32 %v4204_v0, %v5132_v19  ;;  %v2519_v2 = vpop.f32.mrb[53].mxu0  ;;  %3272 = vrot.lane.b32.xlu1 %v2271_v57, %s4492_s16 }
 0x2fc   : > { %v2520_v4 = vadd.f32 %v5132_v19, %v2519_v2  ;;  %3270 = vrot.lane.b32.xlu0 %v2270_v63, %s4492_s16 }
 0x2fd   : > { %v2559_v46 = vmax.f32 %v2525_v1, 0.0 }
 0x2fe   : > { %v2558_v47 = vmax.f32 %v2520_v4, 0.0  ;;  %v4207_v20 = vpop.f32.mrb[54].mxu0 }
 0x2ff   : > { %v2535_v22 = vadd.f32 %v4207_v20, %v5132_v19  ;;  %v2529_v24 = vpop.f32.mrb[55].mxu0  ;;  %3292 = vrot.lane.b32.xlu1 %v2559_v46, %s4493_s17 }
 0x300   : > { %v2530_v25 = vadd.f32 %v5132_v19, %v2529_v24  ;;  %3290 = vrot.lane.b32.xlu0 %v2558_v47, %s4493_s17 }
 0x301   : > { %v2561_v21 = vmax.f32 %v2535_v22, 0.0 }
 0x302   : > { %v2560_v49 = vmax.f32 %v2530_v25, 0.0  ;;  %v4210_v3 = vpop.f32.mrb[56].mxu0 }
 0x303   : > { %v2545_v36 = vadd.f32 %v4210_v3, %v5132_v19  ;;  %v2539_v38 = vpop.f32.mrb[57].mxu0  ;;  %3296 = vrot.lane.b32.xlu1 %v2561_v21, %s4493_s17 }
 0x304   : > { %v2540_v16 = vadd.f32 %v5132_v19, %v2539_v38  ;;  %3294 = vrot.lane.b32.xlu0 %v2560_v49, %s4493_s17 }
 0x305   : > { %v2563_v14 = vmax.f32 %v2545_v36, 0.0 }
 0x306   : > { %v2562_v39 = vmax.f32 %v2540_v16, 0.0  ;;  %v4213_v41 = vpop.f32.mrb[58].mxu0 }
 0x307   : > { %v2555_v27 = vadd.f32 %v4213_v41, %v5132_v19  ;;  %v2549_v42 = vpop.f32.mrb[59].mxu0  ;;  %3300 = vrot.lane.b32.xlu1 %v2563_v14, %s4493_s17 }
 0x308   : > { %v2550_v26 = vadd.f32 %v5132_v19, %v2549_v42  ;;  %3298 = vrot.lane.b32.xlu0 %v2562_v39, %s4493_s17 }
 0x309   : > { %v2565_v51 = vmax.f32 %v2555_v27, 0.0 }
 0x30a   : > { %v2564_v54 = vmax.f32 %v2550_v26, 0.0  ;;  %v4244_v37 = vpop.f32.mrb[60].mxu0 }
 0x30b   : > { %v2819_v23 = vadd.f32 %v4244_v37, %v5132_v19  ;;  %v2813_v55 = vpop.f32.mrb[61].mxu0  ;;  %3304 = vrot.lane.b32.xlu1 %v2565_v51, %s4493_s17 }
 0x30c   : > { %v2814_v58 = vadd.f32 %v5132_v19, %v2813_v55  ;;  %3302 = vrot.lane.b32.xlu0 %v2564_v54, %s4493_s17 }
 0x30d   : > { %v2853_v59 = vmax.f32 %v2819_v23, 0.0 }
 0x30e   : > { %v2852_v60 = vmax.f32 %v2814_v58, 0.0  ;;  %v4247_v61 = vpop.f32.mrb[62].mxu0 }
 0x30f   : > { %v2829_v62 = vadd.f32 %v4247_v61, %v5132_v19  ;;  %v2823_v9 = vpop.f32.mrb[63].mxu0  ;;  %3324 = vrot.lane.b32.xlu1 %v2853_v59, %s4494_s18 }
 0x310   : > { %v2824_v45 = vadd.f32 %v5132_v19, %v2823_v9  ;;  %3322 = vrot.lane.b32.xlu0 %v2852_v60, %s4494_s18 }
 0x311   : > { %v2855_v10 = vmax.f32 %v2829_v62, 0.0 }
 0x312   : > { %v2854_v11 = vmax.f32 %v2824_v45, 0.0  ;;  %v4250_v12 = vpop.f32.mrb[64].mxu0 }
 0x313   : > { %v2839_v29 = vadd.f32 %v4250_v12, %v5132_v19  ;;  %v2833_v30 = vpop.f32.mrb[65].mxu0  ;;  %3328 = vrot.lane.b32.xlu1 %v2855_v10, %s4494_s18 }
 0x314   : > { %v2834_v8 = vadd.f32 %v5132_v19, %v2833_v30  ;;  %3326 = vrot.lane.b32.xlu0 %v2854_v11, %s4494_s18  ;;  %v756_v30 = vadd.f32 %v5132_v19, %v5115_v6 }
 0x315   : > { %v2857_v33 = vmax.f32 %v2839_v29, 0.0 }
 0x316   : > { %v2856_v34 = vmax.f32 %v2834_v8, 0.0  ;;  %v4253_v43 = vpop.f32.mrb[66].mxu0 }
 0x317   : > { %v2849_v44 = vadd.f32 %v4253_v43, %v5132_v19  ;;  %v2843_v56 = vpop.f32.mrb[67].mxu0  ;;  %3332 = vrot.lane.b32.xlu1 %v2857_v33, %s4494_s18  ;;  %v761_v33 = vadd.f32 %v5113_v5, %v5132_v19  ;;  %v794_v43 = vmax.f32 %v756_v30, 0.0 }
 0x318   : > { %v2844_v57 = vadd.f32 %v5132_v19, %v2843_v56  ;;  %3330 = vrot.lane.b32.xlu0 %v2856_v34, %s4494_s18 }
 0x319   : > { %v2859_v63 = vmax.f32 %v2849_v44, 0.0  ;;  %v766_v44 = vadd.f32 %v5132_v19, %v5119_v13 }
 0x31a   : > { %v2858_v0 = vmax.f32 %v2844_v57, 0.0  ;;  %v4284_v1 = vpop.f32.mrb[68].mxu0 }
 0x31b   : > { %v3113_v2 = vadd.f32 %v4284_v1, %v5132_v19  ;;  %v3107_v4 = vpop.f32.mrb[69].mxu0  ;;  %3336 = vrot.lane.b32.xlu1 %v2859_v63, %s4494_s18  ;;  %v795_v63 = vmax.f32 %v761_v33, 0.0  ;;  %v796_v5 = vmax.f32 %v766_v44, 0.0 }
 0x31c   : > { %v3108_v46 = vadd.f32 %v5132_v19, %v3107_v4  ;;  %3334 = vrot.lane.b32.xlu0 %v2858_v0, %s4494_s18  ;;  %v771_v0 = vadd.f32 %v5117_v7, %v5132_v19 }
 0x31d   : > { %v3147_v47 = vmax.f32 %v3113_v2, 0.0  ;;  %v776_v2 = vadd.f32 %v5132_v19, %v5123_v28 }
 0x31e   : > { %v3146_v20 = vmax.f32 %v3108_v46, 0.0  ;;  %v4287_v22 = vpop.f32.mrb[70].mxu0  ;;  %v797_v7 = vmax.f32 %v771_v0, 0.0 }
 0x31f   : > { %3401 = vst.msk [vmem:[%s5250_s22 + $0x28] sm:$0xff] %vm527_vm2, %v3147_v47  ;;  %v3123_v24 = vadd.f32 %v4287_v22, %v5132_v19  ;;  %v3117_v25 = vpop.f32.mrb[71].mxu0  ;;  %v781_v22 = vadd.f32 %v5121_v15, %v5132_v19 }
 0x320   : > { %3398 = vst.msk [vmem:[%s5250_s22 + $0x10] sm:$0xff] %vm527_vm2, %v3146_v20  ;;  %v3118_v21 = vadd.f32 %v5132_v19, %v3117_v25 }
 0x321   : > { %v3149_v49 = vmax.f32 %v3123_v24, 0.0  ;;  %v3165_v3 = vpop.permute.xlu0 %3164 }
 0x322   : > { %v3148_v36 = vmax.f32 %v3118_v21, 0.0  ;;  %v4290_v38 = vpop.f32.mrb[72].mxu0  ;;  %v3347_v13 = vsel %vm527_vm2, %v795_v63, %v3165_v3  ;;  %v798_v21 = vmax.f32 %v776_v2, 0.0 }
 0x323   : > { %3407 = vst.msk [vmem:[%s5250_s22 + $0x58] sm:$0xff] %vm527_vm2, %v3149_v49  ;;  %v3133_v16 = vadd.f32 %v4290_v38, %v5132_v19  ;;  %v3127_v14 = vpop.f32.mrb[73].mxu0  ;;  %v786_v49 = vadd.f32 %v5132_v19, %v5127_v48 }
 0x324   : > { %3404 = vst.msk [vmem:[%s5250_s22 + $0x40] sm:$0xff] %vm527_vm2, %v3148_v36  ;;  %v3128_v39 = vadd.f32 %v5132_v19, %v3127_v14  ;;  %v799_v14 = vmax.f32 %v781_v22, 0.0 }
 0x325   : > { %v3151_v41 = vmax.f32 %v3133_v16, 0.0  ;;  %v3169_v27 = vpop.permute.xlu1 %3168  ;;  %v3163_v42 = vpop.permute.xlu0 %3162 }
 0x326   : > { %v3150_v26 = vmax.f32 %v3128_v39, 0.0  ;;  %v4293_v51 = vpop.f32.mrb[74].mxu0  ;;  %v3346_v56 = vsel %vm527_vm2, %v794_v43, %v3163_v42  ;;  %v3349_v36 = vsel %vm527_vm2, %v797_v7, %v3169_v27  ;;  %v791_v39 = vadd.f32 %v5125_v18, %v5132_v19 }
 0x327   : > { %3413 = vst.msk [vmem:[%s5250_s22 + $0x88] sm:$0xff] %vm527_vm2, %v3151_v41  ;;  %v3143_v54 = vadd.f32 %v4293_v51, %v5132_v19  ;;  %v3137_v37 = vpop.f32.mrb[75].mxu0 }
 0x328   : > { %3410 = vst.msk [vmem:[%s5250_s22 + $0x70] sm:$0xff] %vm527_vm2, %v3150_v26  ;;  %v3138_v23 = vadd.f32 %v5132_v19, %v3137_v37  ;;  %v800_v26 = vmax.f32 %v786_v49, 0.0 }
 0x329   : > { %v3153_v55 = vmax.f32 %v3143_v54, 0.0  ;;  %v3167_v58 = vpop.permute.xlu1 %3166 }
 0x32a   : > { %v3152_v59 = vmax.f32 %v3138_v23, 0.0  ;;  %v3171_v60 = vpop.permute.xlu0 %3170  ;;  %v3348_v46 = vsel %vm527_vm2, %v796_v5, %v3167_v58  ;;  %v801_v23 = vmax.f32 %v791_v39, 0.0 }
 0x32b   : > { %3419 = vst.msk [vmem:[%s5250_s22 + $0xb8] sm:$0xff] %vm527_vm2, %v3153_v55  ;;  %v3350_v38 = vsel %vm527_vm2, %v798_v21, %v3171_v60 }
 0x32c   : > { %3416 = vst.msk [vmem:[%s5250_s22 + $0xa0] sm:$0xff] %vm527_vm2, %v3152_v59 }
 0x32d   : > { %v3173_v61 = vpop.permute.xlu1 %3172 }
 0x32e   : > { %v3175_v62 = vpop.permute.xlu0 %3174  ;;  %v3351_v51 = vsel %vm527_vm2, %v799_v14, %v3173_v61 }
 0x32f   : > { %v3352_v54 = vsel %vm527_vm2, %v800_v26, %v3175_v62 }
 0x331   : > { %v3177_v9 = vpop.permute.xlu1 %3176 }
 0x332   : > { %v3195_v45 = vpop.permute.xlu0 %3194 }
 0x333   : > { %v3355_v6 = vsel %vm3354_vm3, %v3346_v56, %v3195_v45  ;;  %v3353_v45 = vsel %vm527_vm2, %v801_v23, %v3177_v9 }
 0x335   : > { %v3197_v10 = vpop.permute.xlu1 %3196 }
 0x336   : > { %v3199_v11 = vpop.permute.xlu0 %3198  ;;  %v3356_v47 = vsel %vm3354_vm3, %v3347_v13, %v3197_v10 }
 0x337   : > { %v3357_v24 = vsel %vm3354_vm3, %v3348_v46, %v3199_v11 }
 0x339   : > { %v3201_v12 = vpop.permute.xlu1 %3200 }
 0x33a   : > { %v3203_v29 = vpop.permute.xlu0 %3202  ;;  %v3358_v15 = vsel %vm3354_vm3, %v3349_v36, %v3201_v12 }
 0x33b   : > { %v3359_v41 = vsel %vm3354_vm3, %v3350_v38, %v3203_v29 }
 0x33d   : > { %v3205_v8 = vpop.permute.xlu1 %3204 }
 0x33e   : > { %v3207_v34 = vpop.permute.xlu0 %3206  ;;  %v3360_v37 = vsel %vm3354_vm3, %v3351_v51, %v3205_v8 }
 0x33f   : > { %v3361_v55 = vsel %vm3354_vm3, %v3352_v54, %v3207_v34 }
 0x341   : > { %v3209_v57 = vpop.permute.xlu1 %3208 }
 0x342   : > { %v3227_v1 = vpop.permute.xlu0 %3226  ;;  %v3362_v61 = vsel %vm3354_vm3, %v3353_v45, %v3209_v57  ;;  %v1937_v57 = vadd.f32 %v5179_v50, %v5132_v19 }
 0x343   : > { %v3364_v4 = vsel %vm3363_vm4, %v3355_v6, %v3227_v1  ;;  %v1932_v1 = vadd.f32 %v5132_v19, %v5181_v35 }
 0x344   : > { %3396 = vst [vmem:[%s5250_s22] sm:$0xff] %v3364_v4  ;;  %v1971_v2 = vmax.f32 %v1937_v57, 0.0  ;;  %v1947_v4 = vadd.f32 %v5185_v32, %v5132_v19 }
 0x345   : > { %v3229_v20 = vpop.permute.xlu1 %3228  ;;  %v1970_v46 = vmax.f32 %v1932_v1, 0.0 }
 0x346   : > { %v3365_v25 = vsel %vm3363_vm4, %v3356_v47, %v3229_v20  ;;  %v3231_v28 = vpop.permute.xlu0 %3230  ;;  %v1942_v47 = vadd.f32 %v5132_v19, %v5187_v52  ;;  %v1973_v35 = vmax.f32 %v1947_v4, 0.0  ;;  %v1952_v52 = vadd.f32 %v5132_v19, %v5192_v40 }
 0x347   : > { %3399 = vst [vmem:[%s5250_s22 + $0x18] sm:$0xff] %v3365_v25  ;;  %v3366_v3 = vsel %vm3363_vm4, %v3357_v24, %v3231_v28  ;;  %v1957_v24 = vadd.f32 %v5190_v31, %v5132_v19 }
 0x348   : > { %3402 = vst [vmem:[%s5250_s22 + $0x30] sm:$0xff] %v3366_v3  ;;  %v1972_v21 = vmax.f32 %v1942_v47, 0.0 }
 0x349   : > { %v3233_v16 = vpop.permute.xlu1 %3232 }
 0x34a   : > { %v3367_v48 = vsel %vm3363_vm4, %v3358_v15, %v3233_v16  ;;  %v3235_v42 = vpop.permute.xlu0 %3234  ;;  %v1975_v15 = vmax.f32 %v1957_v24, 0.0  ;;  %v1967_v16 = vadd.f32 %v5194_v53, %v5132_v19 }
 0x34b   : > { %3405 = vst [vmem:[%s5250_s22 + $0x48] sm:$0xff] %v3367_v48  ;;  %v3368_v27 = vsel %vm3363_vm4, %v3359_v41, %v3235_v42  ;;  %v1974_v41 = vmax.f32 %v1952_v52, 0.0  ;;  %v1962_v48 = vadd.f32 %v5132_v19, %v5196_v17 }
 0x34c   : > { %3408 = vst [vmem:[%s5250_s22 + $0x60] sm:$0xff] %v3368_v27  ;;  %v1977_v54 = vmax.f32 %v1967_v16, 0.0 }
 0x34d   : > { %v3237_v18 = vpop.permute.xlu1 %3236  ;;  %v1976_v17 = vmax.f32 %v1962_v48, 0.0 }
 0x34e   : > { %v3369_v58 = vsel %vm3363_vm4, %v3360_v37, %v3237_v18  ;;  %v3239_v59 = vpop.permute.xlu0 %3238 }
 0x34f   : > { %3411 = vst [vmem:[%s5250_s22 + $0x78] sm:$0xff] %v3369_v58  ;;  %v3370_v60 = vsel %vm3363_vm4, %v3361_v55, %v3239_v59 }
 0x350   : > { %3414 = vst [vmem:[%s5250_s22 + $0x90] sm:$0xff] %v3370_v60 }
 0x351   : > { %v3241_v10 = vpop.permute.xlu1 %3240 }
 0x352   : > { %v3371_v62 = vsel %vm3363_vm4, %v3362_v61, %v3241_v10 }
 0x353   : > { %3417 = vst [vmem:[%s5250_s22 + $0xa8] sm:$0xff] %v3371_v62 }
 0x361   : > { %v3261_v11 = vpop.permute.xlu1 %3260 }
 0x362   : > { %v3259_v12 = vpop.permute.xlu0 %3258  ;;  %v3373_v20 = vsel %vm527_vm2, %v1971_v2, %v3261_v11 }
 0x363   : > { %v3372_v50 = vsel %vm527_vm2, %v1970_v46, %v3259_v12 }
 0x365   : > { %v3265_v29 = vpop.permute.xlu1 %3264 }
 0x366   : > { %v3263_v30 = vpop.permute.xlu0 %3262  ;;  %v3375_v3 = vsel %vm527_vm2, %v1973_v35, %v3265_v29 }
 0x367   : > { %v3374_v36 = vsel %vm527_vm2, %v1972_v21, %v3263_v30 }
 0x369   : > { %v3269_v8 = vpop.permute.xlu1 %3268 }
 0x36a   : > { %v3267_v33 = vpop.permute.xlu0 %3266  ;;  %v3377_v26 = vsel %vm527_vm2, %v1975_v15, %v3269_v8 }
 0x36b   : > { %v3376_v27 = vsel %vm527_vm2, %v1974_v41, %v3267_v33 }
 0x36d   : > { %v3273_v34 = vpop.permute.xlu1 %3272 }
 0x36e   : > { %v3271_v43 = vpop.permute.xlu0 %3270  ;;  %v3379_v55 = vsel %vm527_vm2, %v1977_v54, %v3273_v34 }
 0x36f   : > { %v3378_v58 = vsel %vm527_vm2, %v1976_v17, %v3271_v43 }
 0x371   : > { %v3293_v44 = vpop.permute.xlu1 %3292 }
 0x372   : > { %v3291_v56 = vpop.permute.xlu0 %3290  ;;  %v3381_v7 = vsel %vm3354_vm3, %v3373_v20, %v3293_v44 }
 0x373   : > { %v3380_v25 = vsel %vm3354_vm3, %v3372_v50, %v3291_v56 }
 0x375   : > { %v3297_v63 = vpop.permute.xlu1 %3296 }
 0x376   : > { %v3295_v0 = vpop.permute.xlu0 %3294  ;;  %v3383_v31 = vsel %vm3354_vm3, %v3375_v3, %v3297_v63 }
 0x377   : > { %v3382_v14 = vsel %vm3354_vm3, %v3374_v36, %v3295_v0 }
 0x379   : > { %v3301_v9 = vpop.permute.xlu1 %3300 }
 0x37a   : > { %v3299_v6 = vpop.permute.xlu0 %3298  ;;  %v3385_v53 = vsel %vm3354_vm3, %v3377_v26, %v3301_v9 }
 0x37b   : > { %v3384_v37 = vsel %vm3354_vm3, %v3376_v27, %v3299_v6 }
 0x37d   : > { %v3305_v5 = vpop.permute.xlu1 %3304 }
 0x37e   : > { %v3303_v13 = vpop.permute.xlu0 %3302  ;;  %v3387_v59 = vsel %vm3354_vm3, %v3379_v55, %v3305_v5 }
 0x37f   : > { %v3386_v45 = vsel %vm3354_vm3, %v3378_v58, %v3303_v13 }
 0x381   : > { %v3325_v22 = vpop.permute.xlu1 %3324 }
 0x382   : > { %v3389_v32 = vsel %vm3363_vm4, %v3381_v7, %v3325_v22  ;;  %v3323_v28 = vpop.permute.xlu0 %3322 }
 0x383   : > { %3400 = vst [vmem:[%s5250_s22 + $0x20] sm:$0xff] %v3389_v32  ;;  %v3388_v49 = vsel %vm3363_vm4, %v3380_v25, %v3323_v28 }
 0x384   : > { %3397 = vst [vmem:[%s5250_s22 + $0x8] sm:$0xff] %v3388_v49 }
 0x385   : > { %v3329_v38 = vpop.permute.xlu1 %3328 }
 0x386   : > { %v3391_v40 = vsel %vm3363_vm4, %v3383_v31, %v3329_v38  ;;  %v3327_v39 = vpop.permute.xlu0 %3326 }
 0x387   : > { %3406 = vst [vmem:[%s5250_s22 + $0x50] sm:$0xff] %v3391_v40  ;;  %v3390_v42 = vsel %vm3363_vm4, %v3382_v14, %v3327_v39 }
 0x388   : > { %3403 = vst [vmem:[%s5250_s22 + $0x38] sm:$0xff] %v3390_v42 }
 0x389   : > { %v3333_v51 = vpop.permute.xlu1 %3332 }
 0x38a   : > { %v3393_v18 = vsel %vm3363_vm4, %v3385_v53, %v3333_v51  ;;  %v3331_v19 = vpop.permute.xlu0 %3330 }
 0x38b   : > { %3412 = vst [vmem:[%s5250_s22 + $0x80] sm:$0xff] %v3393_v18  ;;  %v3392_v23 = vsel %vm3363_vm4, %v3384_v37, %v3331_v19 }
 0x38c   : > { %3409 = vst [vmem:[%s5250_s22 + $0x68] sm:$0xff] %v3392_v23 }
 0x38d   : > { %v3337_v60 = vpop.permute.xlu1 %3336 }
 0x38e   : > { %v3395_v61 = vsel %vm3363_vm4, %v3387_v59, %v3337_v60  ;;  %v3335_v10 = vpop.permute.xlu0 %3334 }
 0x38f   : > { %3418 = vst [vmem:[%s5250_s22 + $0xb0] sm:$0xff] %v3395_v61  ;;  %v3394_v62 = vsel %vm3363_vm4, %v3386_v45, %v3335_v10 }
 0x390   : > { %3415 = vst [vmem:[%s5250_s22 + $0x98] sm:$0xff] %v3394_v62 }
 0x391 PF: > { %s17_s26 = sadd.s32 1, %s4490_s26   ;;  %s5389_s24 = smov %s4486_s25 }
 0x392   : > { %p14_p5 = scmp.ge.s32.totalorder %s17_s26, 6   ;;  %s5390_s25 = smov %s5392_s27 }
 0x394   :  { %16 = sbr.rel (!%p14_p5) target bundleno = 2 (0x2), region = 81 }

</bundles_post_ra>
